<compile_context>
chip_gen: v7x
topology: tpu7x:2x2x1
jax: 0.10.0
libtpu: 0.0.40
codegen_flags: <defaults>
</compile_context>

<pallas_src>
import math
import functools

import jax
import jax.numpy as jnp
from jax.experimental import pallas as pl
from jax.experimental.pallas import tpu as pltpu


def _set_transformer_kernel(x_ref, wqkv_ref, bqkv_ref, wo_ref, bo_ref, out_ref,
                            *, n_layers, n_heads):
    """Processes TB batch elements: L MHSA layers, then mean over the set axis."""
    tb, n, d = x_ref.shape
    dh = d // n_heads
    scale = 1.0 / math.sqrt(dh)

    # x arrives bf16 (wrapper cast) — flatten (TB, N) so each projection is one
    # row-dense matmul filling the MXU.  Activations stay f32 between layers.
    x_in = x_ref[...].reshape(tb * n, d)                                # bf16 (TB*N, D)
    x_f32 = None

    for l in range(n_layers):                                           # static unroll (small L)
        # Fused QKV projection: one (TB*N, D) @ (D, 3D) bf16 matmul, f32 accumulate.
        qkv = jnp.dot(x_in, wqkv_ref[l],
                      preferred_element_type=jnp.float32) + bqkv_ref[l]  # f32 (TB*N, 3D)
        # Hoisted full-width bf16 casts (per review): per-head slices below read
        # already-bf16 tensors, avoiding 3*H sub-128-lane slice+cast relayouts.
        q = qkv[:, :d].reshape(tb, n, d).astype(jnp.bfloat16)
        k = qkv[:, d:2 * d].reshape(tb, n, d).astype(jnp.bfloat16)
        v = qkv[:, 2 * d:].reshape(tb, n, d).astype(jnp.bfloat16)

        # Attention, batched over the TB axis.  The head loop stays a static
        # Python loop with lane slices: merging (TB, H) into one batch dim needs
        # a (0,2,1,3) transpose whose Mosaic lowering should be verified with
        # pl.lower_as_mlir before committing (review item).  TODO(synk): merge
        # heads into the batch dim once that lowering is validated (dh < 128).
        head_outs = []
        for h in range(n_heads):
            hs = slice(h * dh, (h + 1) * dh)
            qh = q[:, :, hs]                                            # bf16 (TB, N, dh)
            kh = k[:, :, hs]
            vh = v[:, :, hs]
            s = jnp.einsum("bqd,bkd->bqk", qh, kh,
                           preferred_element_type=jnp.float32) * scale  # f32 (TB, N, N)
            s = s - jnp.max(s, axis=-1, keepdims=True)
            p = jnp.exp(s)
            # Softmax divide moved to the (otherwise idle) EUP slot.  approx=True
            # adds ~1e-3 rel error per row; use approx=False if accuracy matters.
            p = p * pl.reciprocal(jnp.sum(p, axis=-1, keepdims=True), approx=True)
            oh = jnp.einsum("bqk,bkd->bqd", p.astype(jnp.bfloat16), vh,
                            preferred_element_type=jnp.float32)          # f32 (TB, N, dh)
            head_outs.append(oh.reshape(tb * n, dh))
        attn = jnp.concatenate(head_outs, axis=-1).astype(jnp.bfloat16)  # (TB*N, D)

        # Output projection (bf16 inputs, f32 accumulation).
        x_f32 = jnp.dot(attn, wo_ref[l],
                        preferred_element_type=jnp.float32) + bo_ref[l]
        x_in = x_f32.astype(jnp.bfloat16)                                # next layer's matmul input

    # torch.mean(x, dim=1): mean over the set axis, written as a lane/sublane
    # dense (TB, D) output slab.
    out_ref[...] = jnp.mean(x_f32.reshape(tb, n, d), axis=1)


def _tpu_generation():
    """Best-effort hardware query; every lookup falls back to safe defaults."""
    kind = ""
    try:
        kind = jax.devices()[0].device_kind.lower()
    except Exception:
        pass
    phys_vmem = None
    try:
        phys_vmem = int(pltpu.get_tpu_info().vmem_capacity_bytes)
    except Exception:
        phys_vmem = None
    is_v5 = "v5" in kind
    is_v6 = "v6" in kind
    is_v7 = ("v7" in kind) or ("7x" in kind)
    if phys_vmem is None:
        # Conservative default: v7x-sized VMEM if we can't tell.
        phys_vmem = (128 << 20) if (is_v5 or is_v6) else (64 << 20)
    return dict(
        # MXU row geometry: 4x128 on v5e, 2x256 on v6e/v7x.
        row_align=128 if is_v5 else 256,
        # v6e has the VMEM to pay for a fatter f32 activation slab.
        target_rows=512 if is_v6 else 256,
        # v7x: 2 TensorCores/chip — keep >=2 parallel grid steps; 1-TC chips
        # prefer the single biggest step that fits VMEM.
        min_grid_steps=2 if is_v7 else 1,
        # Leave compiler headroom below physical VMEM (~70%), floor at 32 MiB.
        vmem_limit=max(32 << 20, min(int(phys_vmem * 0.7), 100 << 20)),
    )


def _pick_batch_tile(batch, set_size, *, target_rows, row_align, min_grid_steps):
    """Pick TB: fill MXU rows, keep the (TB, D) output block tile-legal, prefer
    TB dividing B (no wrapper pad), and keep >=min_grid_steps steps."""
    desired = max(1, target_rows // set_size)
    if min_grid_steps > 1 and batch >= min_grid_steps:
        desired = min(desired, batch // min_grid_steps)
    desired = min(desired, batch)

    def legal(tb):  # (TB, D) output block: TB % 8 == 0 or TB == full batch dim.
        return tb == batch or tb % 8 == 0

    # Pass 1: exact divisor of B, MXU-row aligned rows.
    for tb in range(desired, 0, -1):
        if batch % tb == 0 and legal(tb) and (tb * set_size) % row_align == 0:
            return tb
    # Pass 2: exact divisor of B.
    for tb in range(desired, 0, -1):
        if batch % tb == 0 and legal(tb):
            return tb
    # Fallback: sublane-aligned tile + zero padding in the wrapper (padded rows
    # are computed but benign — uniform softmax, sliced off after the call).
    return max(8, (desired // 8) * 8)


def set_transformer_forward(x, params, *, n_heads, block_batch=None):
    """x: (B, N, D) float32.  params: dict of stacked per-layer weights."""
    B, N, D = x.shape
    L = params["wq"].shape[0]

    # Offline weight packing: fuse Q/K/V into one matmul weight; store matmul
    # weights in bf16 (native MXU rate, half the weight DMA), biases stay f32.
    wqkv = jnp.concatenate([params["wq"], params["wk"], params["wv"]],
                           axis=-1).astype(jnp.bfloat16)                # (L, D, 3D)
    bqkv = jnp.concatenate([params["bq"], params["bk"], params["bv"]],
                           axis=-1).astype(jnp.float32)                 # (L, 1, 3D)
    wo = params["wo"].astype(jnp.bfloat16)                              # (L, D, D)
    bo = params["bo"].astype(jnp.float32)                               # (L, 1, D)

    # x is the only per-grid-step streamed input: cast to bf16 to halve its DMA.
    x_bf = x.astype(jnp.bfloat16)

    hw = _tpu_generation()
    tb = block_batch if block_batch is not None else _pick_batch_tile(
        B, N, target_rows=hw["target_rows"], row_align=hw["row_align"],
        min_grid_steps=hw["min_grid_steps"])
    b_pad = pl.cdiv(B, tb) * tb
    if b_pad != B:   # only hit when no legal divisor of B exists
        x_bf = jnp.pad(x_bf, ((0, b_pad - B), (0, 0), (0, 0)))
    grid = (b_pad // tb,)

    kernel = functools.partial(_set_transformer_kernel,
                               n_layers=L, n_heads=n_heads)

    # Resident weights: constant index_map -> single-buffer them (Buffered(1)),
    # double-buffering would only double their VMEM footprint.
    resident = lambda shape: pl.BlockSpec(shape, lambda b: (0,) * len(shape),
                                          pipeline_mode=pl.Buffered(1))

    out = pl.pallas_call(
        kernel,
        out_shape=jax.ShapeDtypeStruct((b_pad, D), jnp.float32),
        grid_spec=pltpu.PrefetchScalarGridSpec(
            num_scalar_prefetch=0,
            grid=grid,
            in_specs=[
                pl.BlockSpec((tb, N, D), lambda b: (b, 0, 0)),          # x batch tile (bf16)
                resident((L, D, 3 * D)), resident((L, 1, 3 * D)),       # fused Wqkv, bqkv
                resident((L, D, D)), resident((L, 1, D)),               # Wo, bo
            ],
            # Lane/sublane-dense (TB, D) output slab per grid step.
            out_specs=pl.BlockSpec((tb, D), lambda b: (b, 0)),
        ),
        compiler_params=pltpu.CompilerParams(
            # Batch-tile axis is embarrassingly parallel (megacore-shardable).
            dimension_semantics=("parallel",),
            vmem_limit_bytes=hw["vmem_limit"],
        ),
    )(x_bf, wqkv, bqkv, wo, bo)
    return out[:B] if b_pad != B else out


def init_params(key, n_layers, dim):
    """Deterministic PyTorch-Linear-style init: U(-1/sqrt(dim), 1/sqrt(dim))."""
    bound = 1.0 / math.sqrt(dim)
    keys = jax.random.split(key, 8)
    u = lambda k, shape: jax.random.uniform(k, shape, jnp.float32, -bound, bound)
    return {
        "wq": u(keys[0], (n_layers, dim, dim)), "bq": u(keys[1], (n_layers, 1, dim)),
        "wk": u(keys[2], (n_layers, dim, dim)), "bk": u(keys[3], (n_layers, 1, dim)),
        "wv": u(keys[4], (n_layers, dim, dim)), "bv": u(keys[5], (n_layers, 1, dim)),
        "wo": u(keys[6], (n_layers, dim, dim)), "bo": u(keys[7], (n_layers, 1, dim)),
    }


def reference_forward(x, params, *, n_heads):
    """Pure-JAX reference, precision-matched to the kernel (bf16 matmul inputs,
    f32 accumulation), so the comparison isolates kernel logic errors."""
    B, N, D = x.shape
    L = params["wq"].shape[0]
    dh = D // n_heads
    scale = 1.0 / math.sqrt(dh)
    bf = jnp.bfloat16
    wqkv = jnp.concatenate([params["wq"], params["wk"], params["wv"]], -1).astype(bf)
    bqkv = jnp.concatenate([params["bq"], params["bk"], params["bv"]], -1)
    wo = params["wo"].astype(bf)
    for l in range(L):
        qkv = jnp.einsum("bnd,df->bnf", x.astype(bf), wqkv[l],
                         preferred_element_type=jnp.float32) + bqkv[l]
        q, k, v = qkv[..., :D], qkv[..., D:2 * D], qkv[..., 2 * D:]
        qh = q.reshape(B, N, n_heads, dh).transpose(0, 2, 1, 3).astype(bf)
        kh = k.reshape(B, N, n_heads, dh).transpose(0, 2, 1, 3).astype(bf)
        vh = v.reshape(B, N, n_heads, dh).transpose(0, 2, 1, 3).astype(bf)
        s = jnp.einsum("bhqd,bhkd->bhqk", qh, kh,
                       preferred_element_type=jnp.float32) * scale
        p = jax.nn.softmax(s, axis=-1)
        o = jnp.einsum("bhqk,bhkd->bhqd", p.astype(bf), vh,
                       preferred_element_type=jnp.float32)
        o = o.transpose(0, 2, 1, 3).reshape(B, N, D)
        x = jnp.einsum("bnd,df->bnf", o.astype(bf), wo[l],
                       preferred_element_type=jnp.float32) + params["bo"][l]
    return jnp.mean(x, axis=1)


if __name__ == "__main__":
    B, N, D = 2, 8, 32      # batch, set size, feature dim
    n_heads, n_layers = 4, 2

    key = jax.random.PRNGKey(0)
    kx, kp = jax.random.split(key)
    x = jax.random.normal(kx, (B, N, D), dtype=jnp.float32)
    params = init_params(kp, n_layers, D)

    out = set_transformer_forward(x, params, n_heads=n_heads)
    out = jax.block_until_ready(out)

    ref = reference_forward(x, params, n_heads=n_heads)
    assert out.shape == (B, D)
    # bf16 matmul inputs + approx reciprocal -> loosened tolerance vs f32.
    assert jnp.allclose(out, ref, atol=2e-2, rtol=2e-2), "mismatch vs JAX reference"

    print("KERNEL_OK")
</pallas_src>

<mosaic_0001>
module attributes {stable_mosaic.version = 11 : i64} {
  func.func @_set_transformer_kernel(%arg0: i32, %arg1: memref<2x8x32xbf16, #tpu.memory_space<vmem>>, %arg2: memref<2x32x96xbf16, #tpu.memory_space<vmem>>, %arg3: memref<2x1x96xf32, #tpu.memory_space<vmem>>, %arg4: memref<2x32x32xbf16, #tpu.memory_space<vmem>>, %arg5: memref<2x1x32xf32, #tpu.memory_space<vmem>>, %arg6: memref<2x32xf32, #tpu.memory_space<vmem>>) attributes {dimension_semantics = [#tpu.dimension_semantics<parallel>], iteration_bounds = array<i64: 1>, scalar_prefetch = 0 : i64, scratch_operands = 0 : i64, tpu.core_type = #tpu.core_type<tc>, window_params = [{transform_indices = @transform_0, window_bounds = array<i64: 2, 8, 32>}, {pipeline_mode = #tpu.pipeline_mode<synchronous>, transform_indices = @transform_1, window_bounds = array<i64: 2, 32, 96>}, {pipeline_mode = #tpu.pipeline_mode<synchronous>, transform_indices = @transform_2, window_bounds = array<i64: 2, 1, 96>}, {pipeline_mode = #tpu.pipeline_mode<synchronous>, transform_indices = @transform_3, window_bounds = array<i64: 2, 32, 32>}, {pipeline_mode = #tpu.pipeline_mode<synchronous>, transform_indices = @transform_4, window_bounds = array<i64: 2, 1, 32>}, {transform_indices = @transform_5, window_bounds = array<i64: 2, 32>}]} {
    %c0 = arith.constant 0 : index
    %c0_0 = arith.constant 0 : index
    %c0_1 = arith.constant 0 : index
    %0 = vector.load %arg1[%c0, %c0_0, %c0_1] : memref<2x8x32xbf16, #tpu.memory_space<vmem>>, vector<2x8x32xbf16>
    %1 = vector.shape_cast %0 : vector<2x8x32xbf16> to vector<16x32xbf16>
    %c0_2 = arith.constant 0 : index
    %c0_3 = arith.constant 0 : index
    %c0_4 = arith.constant 0 : index
    %2 = vector.load %arg2[%c0_2, %c0_3, %c0_4] : memref<2x32x96xbf16, #tpu.memory_space<vmem>>, vector<1x32x96xbf16>
    %3 = vector.shape_cast %2 : vector<1x32x96xbf16> to vector<32x96xbf16>
    %cst = arith.constant dense<0.000000e+00> : vector<16x96xf32>
    %4 = tpu.matmul %1, %3, %cst {dimension_numbers = #tpu.dot_dimension_numbers<[1], [0], [0], [1], [0, 0, 1, 1], [], []>} : vector<16x32xbf16>, vector<32x96xbf16>, vector<16x96xf32> -> vector<16x96xf32>
    %c0_5 = arith.constant 0 : index
    %c0_6 = arith.constant 0 : index
    %c0_7 = arith.constant 0 : index
    %5 = vector.load %arg3[%c0_5, %c0_6, %c0_7] : memref<2x1x96xf32, #tpu.memory_space<vmem>>, vector<1x1x96xf32>
    %6 = vector.shape_cast %5 : vector<1x1x96xf32> to vector<1x96xf32>
    %7 = vector.broadcast %6 : vector<1x96xf32> to vector<16x96xf32>
    %8 = arith.addf %4, %7 : vector<16x96xf32>
    %9 = vector.extract_strided_slice %8 {offsets = [0, 0], sizes = [16, 32], strides = [1, 1]} : vector<16x96xf32> to vector<16x32xf32>
    %10 = vector.shape_cast %9 : vector<16x32xf32> to vector<2x8x32xf32>
    %11 = arith.truncf %10 : vector<2x8x32xf32> to vector<2x8x32xbf16>
    %12 = vector.extract_strided_slice %8 {offsets = [0, 32], sizes = [16, 32], strides = [1, 1]} : vector<16x96xf32> to vector<16x32xf32>
    %13 = vector.shape_cast %12 : vector<16x32xf32> to vector<2x8x32xf32>
    %14 = arith.truncf %13 : vector<2x8x32xf32> to vector<2x8x32xbf16>
    %15 = vector.extract_strided_slice %8 {offsets = [0, 64], sizes = [16, 32], strides = [1, 1]} : vector<16x96xf32> to vector<16x32xf32>
    %16 = vector.shape_cast %15 : vector<16x32xf32> to vector<2x8x32xf32>
    %17 = arith.truncf %16 : vector<2x8x32xf32> to vector<2x8x32xbf16>
    %18 = vector.extract_strided_slice %11 {offsets = [0, 0, 0], sizes = [2, 8, 8], strides = [1, 1, 1]} : vector<2x8x32xbf16> to vector<2x8x8xbf16>
    %19 = vector.extract_strided_slice %14 {offsets = [0, 0, 0], sizes = [2, 8, 8], strides = [1, 1, 1]} : vector<2x8x32xbf16> to vector<2x8x8xbf16>
    %20 = vector.extract_strided_slice %17 {offsets = [0, 0, 0], sizes = [2, 8, 8], strides = [1, 1, 1]} : vector<2x8x32xbf16> to vector<2x8x8xbf16>
    "tpu.trace_start"() <{level = 10 : i32, message = "bqd,bkd->bqk"}> : () -> ()
    %cst_8 = arith.constant dense<0.000000e+00> : vector<2x8x8xf32>
    %21 = tpu.matmul %18, %19, %cst_8 {dimension_numbers = #tpu.dot_dimension_numbers<[2], [2], [1], [1], [0, 0, 0, 1, 1, 1], [0], [0]>} : vector<2x8x8xbf16>, vector<2x8x8xbf16>, vector<2x8x8xf32> -> vector<2x8x8xf32>
    "tpu.trace_stop"() : () -> ()
    %cst_9 = arith.constant 0.353553385 : f32
    %22 = vector.broadcast %cst_9 : f32 to vector<2x8x8xf32>
    %23 = arith.mulf %21, %22 : vector<2x8x8xf32>
    %cst_10 = arith.constant dense<0xFF800000> : vector<2x8xf32>
    %24 = vector.multi_reduction <maximumf>, %23, %cst_10 [2] : vector<2x8x8xf32> to vector<2x8xf32>
    %25 = vector.shape_cast %24 : vector<2x8xf32> to vector<2x8x1xf32>
    %26 = vector.broadcast %25 : vector<2x8x1xf32> to vector<2x8x8xf32>
    %27 = arith.subf %23, %26 : vector<2x8x8xf32>
    %28 = math.exp %27 : vector<2x8x8xf32>
    %cst_11 = arith.constant dense<0.000000e+00> : vector<2x8xf32>
    %29 = vector.multi_reduction <add>, %28, %cst_11 [2] : vector<2x8x8xf32> to vector<2x8xf32>
    %30 = vector.shape_cast %29 : vector<2x8xf32> to vector<2x8x1xf32>
    %31 = tpu.reciprocal %30 {approx = true} : vector<2x8x1xf32> -> vector<2x8x1xf32>
    %32 = vector.broadcast %31 : vector<2x8x1xf32> to vector<2x8x8xf32>
    %33 = arith.mulf %28, %32 : vector<2x8x8xf32>
    %34 = arith.truncf %33 : vector<2x8x8xf32> to vector<2x8x8xbf16>
    "tpu.trace_start"() <{level = 10 : i32, message = "bqk,bkd->bqd"}> : () -> ()
    %cst_12 = arith.constant dense<0.000000e+00> : vector<2x8x8xf32>
    %35 = tpu.matmul %34, %20, %cst_12 {dimension_numbers = #tpu.dot_dimension_numbers<[2], [1], [1], [2], [0, 0, 0, 1, 1, 2], [0], [0]>} : vector<2x8x8xbf16>, vector<2x8x8xbf16>, vector<2x8x8xf32> -> vector<2x8x8xf32>
    "tpu.trace_stop"() : () -> ()
    %36 = vector.shape_cast %35 : vector<2x8x8xf32> to vector<16x8xf32>
    %37 = vector.extract_strided_slice %11 {offsets = [0, 0, 8], sizes = [2, 8, 8], strides = [1, 1, 1]} : vector<2x8x32xbf16> to vector<2x8x8xbf16>
    %38 = vector.extract_strided_slice %14 {offsets = [0, 0, 8], sizes = [2, 8, 8], strides = [1, 1, 1]} : vector<2x8x32xbf16> to vector<2x8x8xbf16>
    %39 = vector.extract_strided_slice %17 {offsets = [0, 0, 8], sizes = [2, 8, 8], strides = [1, 1, 1]} : vector<2x8x32xbf16> to vector<2x8x8xbf16>
    "tpu.trace_start"() <{level = 10 : i32, message = "bqd,bkd->bqk"}> : () -> ()
    %cst_13 = arith.constant dense<0.000000e+00> : vector<2x8x8xf32>
    %40 = tpu.matmul %37, %38, %cst_13 {dimension_numbers = #tpu.dot_dimension_numbers<[2], [2], [1], [1], [0, 0, 0, 1, 1, 1], [0], [0]>} : vector<2x8x8xbf16>, vector<2x8x8xbf16>, vector<2x8x8xf32> -> vector<2x8x8xf32>
    "tpu.trace_stop"() : () -> ()
    %cst_14 = arith.constant 0.353553385 : f32
    %41 = vector.broadcast %cst_14 : f32 to vector<2x8x8xf32>
    %42 = arith.mulf %40, %41 : vector<2x8x8xf32>
    %cst_15 = arith.constant dense<0xFF800000> : vector<2x8xf32>
    %43 = vector.multi_reduction <maximumf>, %42, %cst_15 [2] : vector<2x8x8xf32> to vector<2x8xf32>
    %44 = vector.shape_cast %43 : vector<2x8xf32> to vector<2x8x1xf32>
    %45 = vector.broadcast %44 : vector<2x8x1xf32> to vector<2x8x8xf32>
    %46 = arith.subf %42, %45 : vector<2x8x8xf32>
    %47 = math.exp %46 : vector<2x8x8xf32>
    %cst_16 = arith.constant dense<0.000000e+00> : vector<2x8xf32>
    %48 = vector.multi_reduction <add>, %47, %cst_16 [2] : vector<2x8x8xf32> to vector<2x8xf32>
    %49 = vector.shape_cast %48 : vector<2x8xf32> to vector<2x8x1xf32>
    %50 = tpu.reciprocal %49 {approx = true} : vector<2x8x1xf32> -> vector<2x8x1xf32>
    %51 = vector.broadcast %50 : vector<2x8x1xf32> to vector<2x8x8xf32>
    %52 = arith.mulf %47, %51 : vector<2x8x8xf32>
    %53 = arith.truncf %52 : vector<2x8x8xf32> to vector<2x8x8xbf16>
    "tpu.trace_start"() <{level = 10 : i32, message = "bqk,bkd->bqd"}> : () -> ()
    %cst_17 = arith.constant dense<0.000000e+00> : vector<2x8x8xf32>
    %54 = tpu.matmul %53, %39, %cst_17 {dimension_numbers = #tpu.dot_dimension_numbers<[2], [1], [1], [2], [0, 0, 0, 1, 1, 2], [0], [0]>} : vector<2x8x8xbf16>, vector<2x8x8xbf16>, vector<2x8x8xf32> -> vector<2x8x8xf32>
    "tpu.trace_stop"() : () -> ()
    %55 = vector.shape_cast %54 : vector<2x8x8xf32> to vector<16x8xf32>
    %56 = vector.extract_strided_slice %11 {offsets = [0, 0, 16], sizes = [2, 8, 8], strides = [1, 1, 1]} : vector<2x8x32xbf16> to vector<2x8x8xbf16>
    %57 = vector.extract_strided_slice %14 {offsets = [0, 0, 16], sizes = [2, 8, 8], strides = [1, 1, 1]} : vector<2x8x32xbf16> to vector<2x8x8xbf16>
    %58 = vector.extract_strided_slice %17 {offsets = [0, 0, 16], sizes = [2, 8, 8], strides = [1, 1, 1]} : vector<2x8x32xbf16> to vector<2x8x8xbf16>
    "tpu.trace_start"() <{level = 10 : i32, message = "bqd,bkd->bqk"}> : () -> ()
    %cst_18 = arith.constant dense<0.000000e+00> : vector<2x8x8xf32>
    %59 = tpu.matmul %56, %57, %cst_18 {dimension_numbers = #tpu.dot_dimension_numbers<[2], [2], [1], [1], [0, 0, 0, 1, 1, 1], [0], [0]>} : vector<2x8x8xbf16>, vector<2x8x8xbf16>, vector<2x8x8xf32> -> vector<2x8x8xf32>
    "tpu.trace_stop"() : () -> ()
    %cst_19 = arith.constant 0.353553385 : f32
    %60 = vector.broadcast %cst_19 : f32 to vector<2x8x8xf32>
    %61 = arith.mulf %59, %60 : vector<2x8x8xf32>
    %cst_20 = arith.constant dense<0xFF800000> : vector<2x8xf32>
    %62 = vector.multi_reduction <maximumf>, %61, %cst_20 [2] : vector<2x8x8xf32> to vector<2x8xf32>
    %63 = vector.shape_cast %62 : vector<2x8xf32> to vector<2x8x1xf32>
    %64 = vector.broadcast %63 : vector<2x8x1xf32> to vector<2x8x8xf32>
    %65 = arith.subf %61, %64 : vector<2x8x8xf32>
    %66 = math.exp %65 : vector<2x8x8xf32>
    %cst_21 = arith.constant dense<0.000000e+00> : vector<2x8xf32>
    %67 = vector.multi_reduction <add>, %66, %cst_21 [2] : vector<2x8x8xf32> to vector<2x8xf32>
    %68 = vector.shape_cast %67 : vector<2x8xf32> to vector<2x8x1xf32>
    %69 = tpu.reciprocal %68 {approx = true} : vector<2x8x1xf32> -> vector<2x8x1xf32>
    %70 = vector.broadcast %69 : vector<2x8x1xf32> to vector<2x8x8xf32>
    %71 = arith.mulf %66, %70 : vector<2x8x8xf32>
    %72 = arith.truncf %71 : vector<2x8x8xf32> to vector<2x8x8xbf16>
    "tpu.trace_start"() <{level = 10 : i32, message = "bqk,bkd->bqd"}> : () -> ()
    %cst_22 = arith.constant dense<0.000000e+00> : vector<2x8x8xf32>
    %73 = tpu.matmul %72, %58, %cst_22 {dimension_numbers = #tpu.dot_dimension_numbers<[2], [1], [1], [2], [0, 0, 0, 1, 1, 2], [0], [0]>} : vector<2x8x8xbf16>, vector<2x8x8xbf16>, vector<2x8x8xf32> -> vector<2x8x8xf32>
    "tpu.trace_stop"() : () -> ()
    %74 = vector.shape_cast %73 : vector<2x8x8xf32> to vector<16x8xf32>
    %75 = vector.extract_strided_slice %11 {offsets = [0, 0, 24], sizes = [2, 8, 8], strides = [1, 1, 1]} : vector<2x8x32xbf16> to vector<2x8x8xbf16>
    %76 = vector.extract_strided_slice %14 {offsets = [0, 0, 24], sizes = [2, 8, 8], strides = [1, 1, 1]} : vector<2x8x32xbf16> to vector<2x8x8xbf16>
    %77 = vector.extract_strided_slice %17 {offsets = [0, 0, 24], sizes = [2, 8, 8], strides = [1, 1, 1]} : vector<2x8x32xbf16> to vector<2x8x8xbf16>
    "tpu.trace_start"() <{level = 10 : i32, message = "bqd,bkd->bqk"}> : () -> ()
    %cst_23 = arith.constant dense<0.000000e+00> : vector<2x8x8xf32>
    %78 = tpu.matmul %75, %76, %cst_23 {dimension_numbers = #tpu.dot_dimension_numbers<[2], [2], [1], [1], [0, 0, 0, 1, 1, 1], [0], [0]>} : vector<2x8x8xbf16>, vector<2x8x8xbf16>, vector<2x8x8xf32> -> vector<2x8x8xf32>
    "tpu.trace_stop"() : () -> ()
    %cst_24 = arith.constant 0.353553385 : f32
    %79 = vector.broadcast %cst_24 : f32 to vector<2x8x8xf32>
    %80 = arith.mulf %78, %79 : vector<2x8x8xf32>
    %cst_25 = arith.constant dense<0xFF800000> : vector<2x8xf32>
    %81 = vector.multi_reduction <maximumf>, %80, %cst_25 [2] : vector<2x8x8xf32> to vector<2x8xf32>
    %82 = vector.shape_cast %81 : vector<2x8xf32> to vector<2x8x1xf32>
    %83 = vector.broadcast %82 : vector<2x8x1xf32> to vector<2x8x8xf32>
    %84 = arith.subf %80, %83 : vector<2x8x8xf32>
    %85 = math.exp %84 : vector<2x8x8xf32>
    %cst_26 = arith.constant dense<0.000000e+00> : vector<2x8xf32>
    %86 = vector.multi_reduction <add>, %85, %cst_26 [2] : vector<2x8x8xf32> to vector<2x8xf32>
    %87 = vector.shape_cast %86 : vector<2x8xf32> to vector<2x8x1xf32>
    %88 = tpu.reciprocal %87 {approx = true} : vector<2x8x1xf32> -> vector<2x8x1xf32>
    %89 = vector.broadcast %88 : vector<2x8x1xf32> to vector<2x8x8xf32>
    %90 = arith.mulf %85, %89 : vector<2x8x8xf32>
    %91 = arith.truncf %90 : vector<2x8x8xf32> to vector<2x8x8xbf16>
    "tpu.trace_start"() <{level = 10 : i32, message = "bqk,bkd->bqd"}> : () -> ()
    %cst_27 = arith.constant dense<0.000000e+00> : vector<2x8x8xf32>
    %92 = tpu.matmul %91, %77, %cst_27 {dimension_numbers = #tpu.dot_dimension_numbers<[2], [1], [1], [2], [0, 0, 0, 1, 1, 2], [0], [0]>} : vector<2x8x8xbf16>, vector<2x8x8xbf16>, vector<2x8x8xf32> -> vector<2x8x8xf32>
    "tpu.trace_stop"() : () -> ()
    %93 = vector.shape_cast %92 : vector<2x8x8xf32> to vector<16x8xf32>
    %94 = tpu.concatenate %36, %55, %74, %93 in 1 : vector<16x8xf32>, vector<16x8xf32>, vector<16x8xf32>, vector<16x8xf32> -> vector<16x32xf32>
    %95 = arith.truncf %94 : vector<16x32xf32> to vector<16x32xbf16>
    %c0_28 = arith.constant 0 : index
    %c0_29 = arith.constant 0 : index
    %c0_30 = arith.constant 0 : index
    %96 = vector.load %arg4[%c0_28, %c0_29, %c0_30] : memref<2x32x32xbf16, #tpu.memory_space<vmem>>, vector<1x32x32xbf16>
    %97 = vector.shape_cast %96 : vector<1x32x32xbf16> to vector<32x32xbf16>
    %cst_31 = arith.constant dense<0.000000e+00> : vector<16x32xf32>
    %98 = tpu.matmul %95, %97, %cst_31 {dimension_numbers = #tpu.dot_dimension_numbers<[1], [0], [0], [1], [0, 0, 1, 1], [], []>} : vector<16x32xbf16>, vector<32x32xbf16>, vector<16x32xf32> -> vector<16x32xf32>
    %c0_32 = arith.constant 0 : index
    %c0_33 = arith.constant 0 : index
    %c0_34 = arith.constant 0 : index
    %99 = vector.load %arg5[%c0_32, %c0_33, %c0_34] : memref<2x1x32xf32, #tpu.memory_space<vmem>>, vector<1x1x32xf32>
    %100 = vector.shape_cast %99 : vector<1x1x32xf32> to vector<1x32xf32>
    %101 = vector.broadcast %100 : vector<1x32xf32> to vector<16x32xf32>
    %102 = arith.addf %98, %101 : vector<16x32xf32>
    %103 = arith.truncf %102 : vector<16x32xf32> to vector<16x32xbf16>
    %c1 = arith.constant 1 : index
    %c0_35 = arith.constant 0 : index
    %c0_36 = arith.constant 0 : index
    %104 = vector.load %arg2[%c1, %c0_35, %c0_36] : memref<2x32x96xbf16, #tpu.memory_space<vmem>>, vector<1x32x96xbf16>
    %105 = vector.shape_cast %104 : vector<1x32x96xbf16> to vector<32x96xbf16>
    %cst_37 = arith.constant dense<0.000000e+00> : vector<16x96xf32>
    %106 = tpu.matmul %103, %105, %cst_37 {dimension_numbers = #tpu.dot_dimension_numbers<[1], [0], [0], [1], [0, 0, 1, 1], [], []>} : vector<16x32xbf16>, vector<32x96xbf16>, vector<16x96xf32> -> vector<16x96xf32>
    %c1_38 = arith.constant 1 : index
    %c0_39 = arith.constant 0 : index
    %c0_40 = arith.constant 0 : index
    %107 = vector.load %arg3[%c1_38, %c0_39, %c0_40] : memref<2x1x96xf32, #tpu.memory_space<vmem>>, vector<1x1x96xf32>
    %108 = vector.shape_cast %107 : vector<1x1x96xf32> to vector<1x96xf32>
    %109 = vector.broadcast %108 : vector<1x96xf32> to vector<16x96xf32>
    %110 = arith.addf %106, %109 : vector<16x96xf32>
    %111 = vector.extract_strided_slice %110 {offsets = [0, 0], sizes = [16, 32], strides = [1, 1]} : vector<16x96xf32> to vector<16x32xf32>
    %112 = vector.shape_cast %111 : vector<16x32xf32> to vector<2x8x32xf32>
    %113 = arith.truncf %112 : vector<2x8x32xf32> to vector<2x8x32xbf16>
    %114 = vector.extract_strided_slice %110 {offsets = [0, 32], sizes = [16, 32], strides = [1, 1]} : vector<16x96xf32> to vector<16x32xf32>
    %115 = vector.shape_cast %114 : vector<16x32xf32> to vector<2x8x32xf32>
    %116 = arith.truncf %115 : vector<2x8x32xf32> to vector<2x8x32xbf16>
    %117 = vector.extract_strided_slice %110 {offsets = [0, 64], sizes = [16, 32], strides = [1, 1]} : vector<16x96xf32> to vector<16x32xf32>
    %118 = vector.shape_cast %117 : vector<16x32xf32> to vector<2x8x32xf32>
    %119 = arith.truncf %118 : vector<2x8x32xf32> to vector<2x8x32xbf16>
    %120 = vector.extract_strided_slice %113 {offsets = [0, 0, 0], sizes = [2, 8, 8], strides = [1, 1, 1]} : vector<2x8x32xbf16> to vector<2x8x8xbf16>
    %121 = vector.extract_strided_slice %116 {offsets = [0, 0, 0], sizes = [2, 8, 8], strides = [1, 1, 1]} : vector<2x8x32xbf16> to vector<2x8x8xbf16>
    %122 = vector.extract_strided_slice %119 {offsets = [0, 0, 0], sizes = [2, 8, 8], strides = [1, 1, 1]} : vector<2x8x32xbf16> to vector<2x8x8xbf16>
    "tpu.trace_start"() <{level = 10 : i32, message = "bqd,bkd->bqk"}> : () -> ()
    %cst_41 = arith.constant dense<0.000000e+00> : vector<2x8x8xf32>
    %123 = tpu.matmul %120, %121, %cst_41 {dimension_numbers = #tpu.dot_dimension_numbers<[2], [2], [1], [1], [0, 0, 0, 1, 1, 1], [0], [0]>} : vector<2x8x8xbf16>, vector<2x8x8xbf16>, vector<2x8x8xf32> -> vector<2x8x8xf32>
    "tpu.trace_stop"() : () -> ()
    %cst_42 = arith.constant 0.353553385 : f32
    %124 = vector.broadcast %cst_42 : f32 to vector<2x8x8xf32>
    %125 = arith.mulf %123, %124 : vector<2x8x8xf32>
    %cst_43 = arith.constant dense<0xFF800000> : vector<2x8xf32>
    %126 = vector.multi_reduction <maximumf>, %125, %cst_43 [2] : vector<2x8x8xf32> to vector<2x8xf32>
    %127 = vector.shape_cast %126 : vector<2x8xf32> to vector<2x8x1xf32>
    %128 = vector.broadcast %127 : vector<2x8x1xf32> to vector<2x8x8xf32>
    %129 = arith.subf %125, %128 : vector<2x8x8xf32>
    %130 = math.exp %129 : vector<2x8x8xf32>
    %cst_44 = arith.constant dense<0.000000e+00> : vector<2x8xf32>
    %131 = vector.multi_reduction <add>, %130, %cst_44 [2] : vector<2x8x8xf32> to vector<2x8xf32>
    %132 = vector.shape_cast %131 : vector<2x8xf32> to vector<2x8x1xf32>
    %133 = tpu.reciprocal %132 {approx = true} : vector<2x8x1xf32> -> vector<2x8x1xf32>
    %134 = vector.broadcast %133 : vector<2x8x1xf32> to vector<2x8x8xf32>
    %135 = arith.mulf %130, %134 : vector<2x8x8xf32>
    %136 = arith.truncf %135 : vector<2x8x8xf32> to vector<2x8x8xbf16>
    "tpu.trace_start"() <{level = 10 : i32, message = "bqk,bkd->bqd"}> : () -> ()
    %cst_45 = arith.constant dense<0.000000e+00> : vector<2x8x8xf32>
    %137 = tpu.matmul %136, %122, %cst_45 {dimension_numbers = #tpu.dot_dimension_numbers<[2], [1], [1], [2], [0, 0, 0, 1, 1, 2], [0], [0]>} : vector<2x8x8xbf16>, vector<2x8x8xbf16>, vector<2x8x8xf32> -> vector<2x8x8xf32>
    "tpu.trace_stop"() : () -> ()
    %138 = vector.shape_cast %137 : vector<2x8x8xf32> to vector<16x8xf32>
    %139 = vector.extract_strided_slice %113 {offsets = [0, 0, 8], sizes = [2, 8, 8], strides = [1, 1, 1]} : vector<2x8x32xbf16> to vector<2x8x8xbf16>
    %140 = vector.extract_strided_slice %116 {offsets = [0, 0, 8], sizes = [2, 8, 8], strides = [1, 1, 1]} : vector<2x8x32xbf16> to vector<2x8x8xbf16>
    %141 = vector.extract_strided_slice %119 {offsets = [0, 0, 8], sizes = [2, 8, 8], strides = [1, 1, 1]} : vector<2x8x32xbf16> to vector<2x8x8xbf16>
    "tpu.trace_start"() <{level = 10 : i32, message = "bqd,bkd->bqk"}> : () -> ()
    %cst_46 = arith.constant dense<0.000000e+00> : vector<2x8x8xf32>
    %142 = tpu.matmul %139, %140, %cst_46 {dimension_numbers = #tpu.dot_dimension_numbers<[2], [2], [1], [1], [0, 0, 0, 1, 1, 1], [0], [0]>} : vector<2x8x8xbf16>, vector<2x8x8xbf16>, vector<2x8x8xf32> -> vector<2x8x8xf32>
    "tpu.trace_stop"() : () -> ()
    %cst_47 = arith.constant 0.353553385 : f32
    %143 = vector.broadcast %cst_47 : f32 to vector<2x8x8xf32>
    %144 = arith.mulf %142, %143 : vector<2x8x8xf32>
    %cst_48 = arith.constant dense<0xFF800000> : vector<2x8xf32>
    %145 = vector.multi_reduction <maximumf>, %144, %cst_48 [2] : vector<2x8x8xf32> to vector<2x8xf32>
    %146 = vector.shape_cast %145 : vector<2x8xf32> to vector<2x8x1xf32>
    %147 = vector.broadcast %146 : vector<2x8x1xf32> to vector<2x8x8xf32>
    %148 = arith.subf %144, %147 : vector<2x8x8xf32>
    %149 = math.exp %148 : vector<2x8x8xf32>
    %cst_49 = arith.constant dense<0.000000e+00> : vector<2x8xf32>
    %150 = vector.multi_reduction <add>, %149, %cst_49 [2] : vector<2x8x8xf32> to vector<2x8xf32>
    %151 = vector.shape_cast %150 : vector<2x8xf32> to vector<2x8x1xf32>
    %152 = tpu.reciprocal %151 {approx = true} : vector<2x8x1xf32> -> vector<2x8x1xf32>
    %153 = vector.broadcast %152 : vector<2x8x1xf32> to vector<2x8x8xf32>
    %154 = arith.mulf %149, %153 : vector<2x8x8xf32>
    %155 = arith.truncf %154 : vector<2x8x8xf32> to vector<2x8x8xbf16>
    "tpu.trace_start"() <{level = 10 : i32, message = "bqk,bkd->bqd"}> : () -> ()
    %cst_50 = arith.constant dense<0.000000e+00> : vector<2x8x8xf32>
    %156 = tpu.matmul %155, %141, %cst_50 {dimension_numbers = #tpu.dot_dimension_numbers<[2], [1], [1], [2], [0, 0, 0, 1, 1, 2], [0], [0]>} : vector<2x8x8xbf16>, vector<2x8x8xbf16>, vector<2x8x8xf32> -> vector<2x8x8xf32>
    "tpu.trace_stop"() : () -> ()
    %157 = vector.shape_cast %156 : vector<2x8x8xf32> to vector<16x8xf32>
    %158 = vector.extract_strided_slice %113 {offsets = [0, 0, 16], sizes = [2, 8, 8], strides = [1, 1, 1]} : vector<2x8x32xbf16> to vector<2x8x8xbf16>
    %159 = vector.extract_strided_slice %116 {offsets = [0, 0, 16], sizes = [2, 8, 8], strides = [1, 1, 1]} : vector<2x8x32xbf16> to vector<2x8x8xbf16>
    %160 = vector.extract_strided_slice %119 {offsets = [0, 0, 16], sizes = [2, 8, 8], strides = [1, 1, 1]} : vector<2x8x32xbf16> to vector<2x8x8xbf16>
    "tpu.trace_start"() <{level = 10 : i32, message = "bqd,bkd->bqk"}> : () -> ()
    %cst_51 = arith.constant dense<0.000000e+00> : vector<2x8x8xf32>
    %161 = tpu.matmul %158, %159, %cst_51 {dimension_numbers = #tpu.dot_dimension_numbers<[2], [2], [1], [1], [0, 0, 0, 1, 1, 1], [0], [0]>} : vector<2x8x8xbf16>, vector<2x8x8xbf16>, vector<2x8x8xf32> -> vector<2x8x8xf32>
    "tpu.trace_stop"() : () -> ()
    %cst_52 = arith.constant 0.353553385 : f32
    %162 = vector.broadcast %cst_52 : f32 to vector<2x8x8xf32>
    %163 = arith.mulf %161, %162 : vector<2x8x8xf32>
    %cst_53 = arith.constant dense<0xFF800000> : vector<2x8xf32>
    %164 = vector.multi_reduction <maximumf>, %163, %cst_53 [2] : vector<2x8x8xf32> to vector<2x8xf32>
    %165 = vector.shape_cast %164 : vector<2x8xf32> to vector<2x8x1xf32>
    %166 = vector.broadcast %165 : vector<2x8x1xf32> to vector<2x8x8xf32>
    %167 = arith.subf %163, %166 : vector<2x8x8xf32>
    %168 = math.exp %167 : vector<2x8x8xf32>
    %cst_54 = arith.constant dense<0.000000e+00> : vector<2x8xf32>
    %169 = vector.multi_reduction <add>, %168, %cst_54 [2] : vector<2x8x8xf32> to vector<2x8xf32>
    %170 = vector.shape_cast %169 : vector<2x8xf32> to vector<2x8x1xf32>
    %171 = tpu.reciprocal %170 {approx = true} : vector<2x8x1xf32> -> vector<2x8x1xf32>
    %172 = vector.broadcast %171 : vector<2x8x1xf32> to vector<2x8x8xf32>
    %173 = arith.mulf %168, %172 : vector<2x8x8xf32>
    %174 = arith.truncf %173 : vector<2x8x8xf32> to vector<2x8x8xbf16>
    "tpu.trace_start"() <{level = 10 : i32, message = "bqk,bkd->bqd"}> : () -> ()
    %cst_55 = arith.constant dense<0.000000e+00> : vector<2x8x8xf32>
    %175 = tpu.matmul %174, %160, %cst_55 {dimension_numbers = #tpu.dot_dimension_numbers<[2], [1], [1], [2], [0, 0, 0, 1, 1, 2], [0], [0]>} : vector<2x8x8xbf16>, vector<2x8x8xbf16>, vector<2x8x8xf32> -> vector<2x8x8xf32>
    "tpu.trace_stop"() : () -> ()
    %176 = vector.shape_cast %175 : vector<2x8x8xf32> to vector<16x8xf32>
    %177 = vector.extract_strided_slice %113 {offsets = [0, 0, 24], sizes = [2, 8, 8], strides = [1, 1, 1]} : vector<2x8x32xbf16> to vector<2x8x8xbf16>
    %178 = vector.extract_strided_slice %116 {offsets = [0, 0, 24], sizes = [2, 8, 8], strides = [1, 1, 1]} : vector<2x8x32xbf16> to vector<2x8x8xbf16>
    %179 = vector.extract_strided_slice %119 {offsets = [0, 0, 24], sizes = [2, 8, 8], strides = [1, 1, 1]} : vector<2x8x32xbf16> to vector<2x8x8xbf16>
    "tpu.trace_start"() <{level = 10 : i32, message = "bqd,bkd->bqk"}> : () -> ()
    %cst_56 = arith.constant dense<0.000000e+00> : vector<2x8x8xf32>
    %180 = tpu.matmul %177, %178, %cst_56 {dimension_numbers = #tpu.dot_dimension_numbers<[2], [2], [1], [1], [0, 0, 0, 1, 1, 1], [0], [0]>} : vector<2x8x8xbf16>, vector<2x8x8xbf16>, vector<2x8x8xf32> -> vector<2x8x8xf32>
    "tpu.trace_stop"() : () -> ()
    %cst_57 = arith.constant 0.353553385 : f32
    %181 = vector.broadcast %cst_57 : f32 to vector<2x8x8xf32>
    %182 = arith.mulf %180, %181 : vector<2x8x8xf32>
    %cst_58 = arith.constant dense<0xFF800000> : vector<2x8xf32>
    %183 = vector.multi_reduction <maximumf>, %182, %cst_58 [2] : vector<2x8x8xf32> to vector<2x8xf32>
    %184 = vector.shape_cast %183 : vector<2x8xf32> to vector<2x8x1xf32>
    %185 = vector.broadcast %184 : vector<2x8x1xf32> to vector<2x8x8xf32>
    %186 = arith.subf %182, %185 : vector<2x8x8xf32>
    %187 = math.exp %186 : vector<2x8x8xf32>
    %cst_59 = arith.constant dense<0.000000e+00> : vector<2x8xf32>
    %188 = vector.multi_reduction <add>, %187, %cst_59 [2] : vector<2x8x8xf32> to vector<2x8xf32>
    %189 = vector.shape_cast %188 : vector<2x8xf32> to vector<2x8x1xf32>
    %190 = tpu.reciprocal %189 {approx = true} : vector<2x8x1xf32> -> vector<2x8x1xf32>
    %191 = vector.broadcast %190 : vector<2x8x1xf32> to vector<2x8x8xf32>
    %192 = arith.mulf %187, %191 : vector<2x8x8xf32>
    %193 = arith.truncf %192 : vector<2x8x8xf32> to vector<2x8x8xbf16>
    "tpu.trace_start"() <{level = 10 : i32, message = "bqk,bkd->bqd"}> : () -> ()
    %cst_60 = arith.constant dense<0.000000e+00> : vector<2x8x8xf32>
    %194 = tpu.matmul %193, %179, %cst_60 {dimension_numbers = #tpu.dot_dimension_numbers<[2], [1], [1], [2], [0, 0, 0, 1, 1, 2], [0], [0]>} : vector<2x8x8xbf16>, vector<2x8x8xbf16>, vector<2x8x8xf32> -> vector<2x8x8xf32>
    "tpu.trace_stop"() : () -> ()
    %195 = vector.shape_cast %194 : vector<2x8x8xf32> to vector<16x8xf32>
    %196 = tpu.concatenate %138, %157, %176, %195 in 1 : vector<16x8xf32>, vector<16x8xf32>, vector<16x8xf32>, vector<16x8xf32> -> vector<16x32xf32>
    %197 = arith.truncf %196 : vector<16x32xf32> to vector<16x32xbf16>
    %c1_61 = arith.constant 1 : index
    %c0_62 = arith.constant 0 : index
    %c0_63 = arith.constant 0 : index
    %198 = vector.load %arg4[%c1_61, %c0_62, %c0_63] : memref<2x32x32xbf16, #tpu.memory_space<vmem>>, vector<1x32x32xbf16>
    %199 = vector.shape_cast %198 : vector<1x32x32xbf16> to vector<32x32xbf16>
    %cst_64 = arith.constant dense<0.000000e+00> : vector<16x32xf32>
    %200 = tpu.matmul %197, %199, %cst_64 {dimension_numbers = #tpu.dot_dimension_numbers<[1], [0], [0], [1], [0, 0, 1, 1], [], []>} : vector<16x32xbf16>, vector<32x32xbf16>, vector<16x32xf32> -> vector<16x32xf32>
    %c1_65 = arith.constant 1 : index
    %c0_66 = arith.constant 0 : index
    %c0_67 = arith.constant 0 : index
    %201 = vector.load %arg5[%c1_65, %c0_66, %c0_67] : memref<2x1x32xf32, #tpu.memory_space<vmem>>, vector<1x1x32xf32>
    %202 = vector.shape_cast %201 : vector<1x1x32xf32> to vector<1x32xf32>
    %203 = vector.broadcast %202 : vector<1x32xf32> to vector<16x32xf32>
    %204 = arith.addf %200, %203 : vector<16x32xf32>
    %205 = vector.shape_cast %204 : vector<16x32xf32> to vector<2x8x32xf32>
    %cst_68 = arith.constant dense<0.000000e+00> : vector<2x32xf32>
    %206 = vector.multi_reduction <add>, %205, %cst_68 [1] : vector<2x8x32xf32> to vector<2x32xf32>
    %cst_69 = arith.constant 8.000000e+00 : f32
    %207 = vector.broadcast %cst_69 : f32 to vector<2x32xf32>
    %208 = arith.divf %206, %207 : vector<2x32xf32>
    %c0_70 = arith.constant 0 : index
    %c0_71 = arith.constant 0 : index
    %209 = vector.load %arg6[%c0_70, %c0_71] : memref<2x32xf32, #tpu.memory_space<vmem>>, vector<2x32xf32>
    tpu.vector_store %arg6[%c0_70, %c0_71], %208 {strides = array<i32>} : memref<2x32xf32, #tpu.memory_space<vmem>>, vector<2x32xf32>,
    return
  }
  func.func @transform_0(%arg0: i32) -> (i32, i32, i32) {
    %c0_i32 = arith.constant 0 : i32
    %c0_i32_0 = arith.constant 0 : i32
    %c0_i32_1 = arith.constant 0 : i32
    return %arg0, %c0_i32, %c0_i32_0 : i32, i32, i32
  }
  func.func @transform_1(%arg0: i32) -> (i32, i32, i32) {
    %c0_i32 = arith.constant 0 : i32
    %c0_i32_0 = arith.constant 0 : i32
    %c0_i32_1 = arith.constant 0 : i32
    %c0_i32_2 = arith.constant 0 : i32
    return %c0_i32, %c0_i32_0, %c0_i32_1 : i32, i32, i32
  }
  func.func @transform_2(%arg0: i32) -> (i32, i32, i32) {
    %c0_i32 = arith.constant 0 : i32
    %c0_i32_0 = arith.constant 0 : i32
    %c0_i32_1 = arith.constant 0 : i32
    %c0_i32_2 = arith.constant 0 : i32
    return %c0_i32, %c0_i32_0, %c0_i32_1 : i32, i32, i32
  }
  func.func @transform_3(%arg0: i32) -> (i32, i32, i32) {
    %c0_i32 = arith.constant 0 : i32
    %c0_i32_0 = arith.constant 0 : i32
    %c0_i32_1 = arith.constant 0 : i32
    %c0_i32_2 = arith.constant 0 : i32
    return %c0_i32, %c0_i32_0, %c0_i32_1 : i32, i32, i32
  }
  func.func @transform_4(%arg0: i32) -> (i32, i32, i32) {
    %c0_i32 = arith.constant 0 : i32
    %c0_i32_0 = arith.constant 0 : i32
    %c0_i32_1 = arith.constant 0 : i32
    %c0_i32_2 = arith.constant 0 : i32
    return %c0_i32, %c0_i32_0, %c0_i32_1 : i32, i32, i32
  }
  func.func @transform_5(%arg0: i32) -> (i32, i32) {
    %c0_i32 = arith.constant 0 : i32
    %c0_i32_0 = arith.constant 0 : i32
    return %arg0, %c0_i32 : i32, i32
  }
}

</mosaic_0001>

<bundles_post_ra>
// kernel: tpu_custom_call.1
= control target key start
LH: loop header
LB: loop body
LE: loop exit
PB: predicated region body
PF: predicated region fallthrough
CT: control target
= control target key end

     0   :  { %10 = vsyncpa [#allocation3], 0  ;;  %s3284_s0 = inlined_call_operand.hbm [shape: bf16[2,8,32], index: 0, kind: input, shape index: {}]   ;;  %s3285_s1 = inlined_call_operand.hbm [shape: bf16[2,32,96], index: 1, kind: input, shape index: {}]   ;;  %s3286_s2 = inlined_call_operand.vmem [shape: f32[2,1,96], index: 2, kind: input, shape index: {}]   ;;  %s3287_s3 = inlined_call_operand.hbm [shape: bf16[2,32,32], index: 3, kind: input, shape index: {}]   ;;  %s3288_s4 = inlined_call_operand.vmem [shape: f32[2,1,32], index: 4, kind: input, shape index: {}]   ;;  %s3289_s5 = inlined_call_operand.hbm [shape: f32[2,32], index: 5, kind: output, shape index: {}]  }
   0x1   :  { %11 = vsyncpa [#allocation6], 0 }
   0x2   :  { %12 = vsyncpa [#allocation4], 0  ;;  %s2795_s18 = smov [#allocation5]   ;;  %s2796_s20 = smov [#allocation2]  }
   0x3   :  { %s30_s19 = sshll.u32 %s2795_s18, 4  ;;  %s18_s21 = sshll.u32 %s2796_s20, 4  ;;  %s31_s19 = int_to_ptr.vmem [resolvable:$true] %s30_s19  ;;  %s2846_s21 = int_to_ptr.vmem [resolvable:$true] %s18_s21 }
   0x4   :  { %s2701_s24 = scalar_lea.hbm %s3285_s1, 512 }
   0x5   :  { %p2702_p0 = scmp.ne.s32.totalorder %s3285_s1, %s2701_s24  ;;  %p2705_p1 = scmp.lt.u32.totalorder %s2701_s24, %s3285_s1 }
   0x7   :  { %p2707_p2 = pnand %p2705_p1, %p2702_p0 }
   0x9   :  { %2710 = shalt.err (!%p2707_p2)
}
   0xa   :  { %s2711_s29 = scalar_lea.vmem %s31_s19, 512  ;;  %p2716_p4 = scmp.lt.s32.totalorder %s31_s19, %s31_s19 }
   0xb   :  { %p2712_p3 = scmp.ne.s32.totalorder %s31_s19, %s2711_s29  ;;  %p2717_p5 = scmp.lt.s32.totalorder %s2711_s29, %s2711_s29 }
   0xd   :  { %p2718_p6 = por %p2717_p5, %p2716_p4 }
   0xf   :  { %p2719_p7 = pnand %p2718_p6, %p2712_p3 }
  0x11   :  { %2722 = shalt.err (!%p2719_p7)
}
  0x12   :  { %s2797_s30 = smov 64   ;;  %s2798_s6 = smov 4  }
  0x13   :  { %36 = dma.hbm_to_vmem [thread:$0]  %s3285_s1, 512, %s31_s19, [#allocation6], %s2797_s30, %s2797_s30, %s2798_s6  }
  0x14   :  { %s2723_s11 = scalar_lea.hbm %s3284_s0, 128 }
  0x15   :  { %p2724_p8 = scmp.ne.s32.totalorder %s3284_s0, %s2723_s11  ;;  %p2727_p9 = scmp.lt.u32.totalorder %s2723_s11, %s3284_s0 }
  0x17   :  { %p2729_p10 = pnand %p2727_p9, %p2724_p8 }
  0x19   :  { %2732 = shalt.err (!%p2729_p10)
}
  0x1a   :  { %s2733_s16 = scalar_lea.vmem %s2846_s21, 128  ;;  %p2738_p12 = scmp.lt.s32.totalorder %s2846_s21, %s2846_s21 }
  0x1b   :  { %p2734_p11 = scmp.ne.s32.totalorder %s2846_s21, %s2733_s16  ;;  %p2739_p13 = scmp.lt.s32.totalorder %s2733_s16, %s2733_s16 }
  0x1d   :  { %p2740_p0 = por %p2739_p13, %p2738_p12 }
  0x1f   :  { %p2741_p1 = pnand %p2740_p0, %p2734_p11 }
  0x21   :  { %2744 = shalt.err (!%p2741_p1)
}
  0x22   :  { %24 = dma.hbm_to_vmem [thread:$0]  %s3284_s0, 128, %s2846_s21, [#allocation3], %s2797_s30, %s2797_s30, %s2798_s6  }
  0x23   :  { %s2799_s18 = smov [#allocation7]   ;;  %s2745_s23 = scalar_lea.hbm %s3287_s3, 512 }
  0x24   :  { %s44_s19 = sshll.u32 %s2799_s18, 4  ;;  %p2746_p2 = scmp.ne.s32.totalorder %s3287_s3, %s2745_s23  ;;  %s45_s19 = int_to_ptr.vmem [resolvable:$true] %s44_s19 }
  0x25   :  { %p2749_p3 = scmp.lt.u32.totalorder %s2745_s23, %s3287_s3 }
  0x27   :  { %p2751_p4 = pnand %p2749_p3, %p2746_p2 }
  0x29   :  { %2754 = shalt.err (!%p2751_p4)
}
  0x2a   :  { %s2755_s28 = scalar_lea.vmem %s45_s19, 512  ;;  %p2760_p6 = scmp.lt.s32.totalorder %s45_s19, %s45_s19 }
  0x2b   :  { %p2756_p5 = scmp.ne.s32.totalorder %s45_s19, %s2755_s28  ;;  %p2761_p7 = scmp.lt.s32.totalorder %s2755_s28, %s2755_s28 }
  0x2d   :  { %p2762_p8 = por %p2761_p7, %p2760_p6 }
  0x2f   :  { %p2763_p9 = pnand %p2762_p8, %p2756_p5 }
  0x31   :  { %2766 = shalt.err (!%p2763_p9)
}
  0x32   :  { %50 = dma.hbm_to_vmem [thread:$0]  %s3287_s3, 512, %s45_s19, [#allocation6], %s2797_s30, %s2797_s30, %s2798_s6  }
  0x33   :  { %2789 = dma.done.wait [#allocation3], 128  }
  0x34   :  { %2790 = vsyncadd [#allocation3], 4294967168 }
  0x35   :  { %2791 = dma.done.wait [#allocation6], 1024  }
  0x36   :  { %2792 = vsyncadd [#allocation6], 4294966272  ;;  %v2800_v0 = vmov 0.0   ;;  %vm2801_vm0 = vmmov 0   ;;  %v2628_v1 = vld [vmem:[#allocation5] sm:$0xff]   ;;  %v2629_v2 = vld [vmem:[#allocation5 + $0x8] sm:$0xff]  }
  0x37   :  { %2353 = vmatprep.subr.bf16.mxu0 %v2800_v0  ;;  %2357 = vmatprep.mubr.msk.bf16.mxu0 %vm2801_vm0, %v2800_v0  ;;  %v2630_v3 = vld [vmem:[#allocation2] sm:$0xff]   ;;  %vm93_vm1 = vcmask 261120   ;;  %s2802_s6 = smov 96   ;;  %vm143_vm2 = vcmask 64512   ;;  %s2803_s7 = smov 88   ;;  %vm270_vm3 = vcmask 1043456  }
  0x38   :  { %2361 = vmatprep.subr.bf16.mxu1 %v2800_v0  ;;  %2363 = vmatprep.mubr.msk.bf16.mxu1 %vm2801_vm0, %v2800_v0  ;;  %v2226_v4 = vld [vmem:[%s3286_s2] ss:$0 sm:$0xff]  ;;  %s2804_s8 = smov 120   ;;  %s2805_s9 = smov 56   ;;  %vm1054_vm4 = vcmask 130048   ;;  %vm1057_vm5 = vcmask 195584  }
  0x39   :  { %2354 = vmatpush3.bf16.msra.mxu0 %v2628_v1  ;;  %s2806_s10 = smov 80   ;;  %s2807_s11 = smov 112   ;;  %vm2205_vm6 = vcmask 1041409   ;;  %vm2208_vm7 = vcmask 254976  }
  0x3a   :  { %2355 = vmatprep.subr.bf16.mxu0 %v2800_v0  ;;  %s2808_s12 = smov 48   ;;  %s2809_s13 = smov 72  }
  0x3b   :  { %s2810_s14 = smov 104   ;;  %s2811_s15 = smov 40  }
  0x3c   :  { %s2812_s16 = smov 8   ;;  %s2813_s1 = smov 16  }
  0x3d   :  { %2356 = vmatpush3.bf16.msra.mxu0 %v2629_v2  ;;  %s2814_s17 = smov 24  }
  0x3e   :  { %2367 = vmatprep.subr.bf16.mxu0 %v2800_v0 }
  0x40   :  { %2358 = vmatmul.mubr.msk.bf16.vlgmr.msra.gmra.mrb[0].mxu0 %vm93_vm1, %v2630_v3 }
  0x41   :  { %2369 = vmatprep.mubr.msk.bf16.mxu0 %vm2801_vm0, %v2800_v0 }
 0x113   :  { %v131_v5 = vpop.f32.mrb[0].mxu0 }
 0x114   :  { %v132_v6 = vadd.f32 %v2226_v4, %v131_v5  ;;  %v2359_v7 = vpop.f32.mrb[1].mxu0 }
 0x115   :  { %v134_v8 = vpop.f32.mrb[2].mxu0 }
 0x116   :  { %v2912_v9 = vpack.c.bf16 %v132_v6, %v132_v6  ;;  %v135_v10 = vadd.f32 %v2226_v4, %v134_v8  ;;  %v2360_v11 = vpop.f32.mrb[3].mxu0 }
 0x118   :  { %141 = vrot.lane.b32.xlu0 %v2912_v9, %s2802_s6  ;;  %v2916_v12 = vpack.c.bf16 %v135_v10, %v135_v10 }
 0x11c   :  { %191 = vrot.lane.b32.xlu0 %v2916_v12, %s2802_s6 }
 0x18a   :  { %v142_v13 = vpop.permute.xlu0 %141 }
 0x18b   :  { %v148_v14 = vsel %vm143_vm2, %v142_v13, 0 }
 0x18c   :  { %2362 = vmatpush3.bf16.xpose.msra.mxu1 %v148_v14 }
 0x18d   :  { %2373 = vmatprep.subr.bf16.mxu1 %v2800_v0 }
 0x18e   :  { %v192_v15 = vpop.permute.xlu0 %191 }
 0x18f   :  { %v197_v16 = vsel %vm143_vm2, %v192_v15, 0 }
 0x190   :  { %2368 = vmatpush3.bf16.xpose.msra.mxu0 %v197_v16 }
 0x191   :  { %2379 = vmatprep.subr.bf16.mxu0 %v2800_v0 }
 0x193   :  { %2364 = vmatmul.mubr.msk.bf16.vlgmr.msra.gmra.mrb[0].mxu1 %vm143_vm2, %v2912_v9 }
 0x194   :  { %2375 = vmatprep.mubr.msk.bf16.mxu1 %vm2801_vm0, %v2800_v0 }
 0x197   :  { %2370 = vmatmul.mubr.msk.bf16.vlgmr.msra.gmra.mrb[4].mxu0 %vm143_vm2, %v2916_v12 }
 0x198   :  { %2381 = vmatprep.mubr.msk.bf16.mxu0 %vm2801_vm0, %v2800_v0 }
 0x266   :  { %v184_v17 = vpop.f32.mrb[0].mxu1 }
 0x267   :  { %v239_v18 = vmul.f32 0.35355338, %v184_v17  ;;  %v2365_v19 = vpop.f32.mrb[1].mxu1 }
 0x268   :  { %v187_v20 = vpop.f32.mrb[2].mxu1 }
 0x269   :  { %v2366_v21 = vpop.f32.mrb[3].mxu1  ;;  %v241_v22 = vsel %vm143_vm2, %v239_v18, -inf }
 0x26a   :  { %242 = vmax.xlane.f32.xlu1 %v241_v22  ;;  %v233_v23 = vpop.f32.mrb[4].mxu0 }
 0x26b   :  { %v240_v24 = vmul.f32 0.35355338, %v233_v23  ;;  %v2371_v25 = vpop.f32.mrb[5].mxu0 }
 0x26c   :  { %v236_v26 = vpop.f32.mrb[6].mxu0 }
 0x26d   :  { %v2372_v27 = vpop.f32.mrb[7].mxu0  ;;  %v244_v28 = vsel %vm143_vm2, %v240_v24, -inf }
 0x26e   :  { %245 = vmax.xlane.f32.xlu1 %v244_v28 }
 0x27f   :  { %265 = vrot.lane.b32.xlu1 %v2912_v9, %s2797_s30 }
 0x283   :  { %314 = vrot.lane.b32.xlu1 %v2916_v12, %s2797_s30 }
 0x287   :  { %364 = vrot.lane.b32.xlu1 %v2912_v9, %s2803_s7 }
 0x2f7   :  { %v243_v29 = vpop.xlane.xlu1 %242 }
 0x2f8   :  { %v247_v30 = vsub.f32 %v239_v18, %v243_v29 }
 0x2fa   :  { %v249_v31 = vmul.f32 1.442695, %v247_v30 }
 0x2fb   :  { %v246_v32 = vpop.xlane.xlu1 %245 }
 0x2fc   :  { %2637 = vpow2.f32 %v249_v31  ;;  %v248_v33 = vsub.f32 %v240_v24, %v246_v32 }
 0x2fe   :  { %v251_v34 = vmul.f32 1.442695, %v248_v33 }
 0x2ff   :  { %v266_v35 = vpop.permute.xlu1 %265 }
 0x300   :  { %2639 = vpow2.f32 %v251_v34  ;;  %v272_v36 = vsel %vm270_vm3, %v266_v35, 0 }
 0x301   :  { %2374 = vmatpush3.bf16.msra.mxu1 %v272_v36 }
 0x302   :  { %2385 = vmatprep.subr.bf16.mxu1 %v2800_v0 }
 0x303   :  { %v315_v37 = vpop.permute.xlu1 %314 }
 0x304   :  { %v320_v38 = vsel %vm270_vm3, %v315_v37, 0 }
 0x305   :  { %2380 = vmatpush3.bf16.msra.mxu0 %v320_v38 }
 0x306   :  { %v2638_v39 = vpop.eup %2637  ;;  %2391 = vmatprep.subr.bf16.mxu0 %v2800_v0 }
 0x307   :  { %v253_v40 = vsel %vm143_vm2, %v2638_v39, 0.0  ;;  %v365_v43 = vpop.permute.xlu1 %364 }
 0x308   :  { %254 = vadd.xlane.f32.xlu0 %v253_v40  ;;  %v370_v50 = vsel %vm143_vm2, %v365_v43, 0 }
 0x30a   :  { %v2640_v41 = vpop.eup %2639 }
 0x30b   :  { %v256_v42 = vsel %vm143_vm2, %v2640_v41, 0.0 }
 0x30c   :  { %257 = vadd.xlane.f32.xlu1 %v256_v42 }
 0x31d   :  { %414 = vrot.lane.b32.xlu1 %v2916_v12, %s2803_s7 }
 0x31e   :  { %362 = vrot.lane.b32.xlu0 %v2912_v9, %s2804_s8 }
 0x321   :  { %412 = vrot.lane.b32.xlu1 %v2916_v12, %s2804_s8 }
 0x395   :  { %v255_v44 = vpop.xlane.xlu0 %254 }
 0x396   :  { %2641 = vrcp.f32 %v255_v44 }
 0x399   :  { %v258_v45 = vpop.xlane.xlu1 %257  ;;  %v363_v55 = vpop.permute.xlu0 %362 }
 0x39a   :  { %2643 = vrcp.f32 %v258_v45 }
 0x39d   :  { %v415_v52 = vpop.permute.xlu1 %414 }
 0x39e   :  { %v420_v54 = vsel %vm143_vm2, %v415_v52, 0 }
 0x3a0   :  { %v2642_v46 = vpop.eup %2641 }
 0x3a1   :  { %v261_v47 = vmul.f32 %v2642_v46, %v2638_v39  ;;  %v413_v56 = vpop.permute.xlu1 %412 }
 0x3a3   :  { %v263_v48 = vpack.c.bf16 %v261_v47, %v261_v47 }
 0x3a4   :  { %v2644_v49 = vpop.eup %2643 }
 0x3a5   :  { %v262_v51 = vmul.f32 %v2644_v49, %v2640_v41  ;;  %2376 = vmatmul.mubr.msk.bf16.vlgmr.msra.gmra.mrb[4].mxu1 %vm143_vm2, %v263_v48 }
 0x3a6   :  { %2386 = vmatpush3.bf16.xpose.msra.mxu1 %v370_v50  ;;  %2387 = vmatprep.mubr.msk.bf16.mxu1 %vm2801_vm0, %v2800_v0 }
 0x3a7   :  { %v264_v53 = vpack.c.bf16 %v262_v51, %v262_v51  ;;  %2397 = vmatprep.subr.bf16.mxu1 %v2800_v0 }
 0x3a9   :  { %2382 = vmatmul.mubr.msk.bf16.vlgmr.msra.gmra.mrb[8].mxu0 %vm143_vm2, %v264_v53 }
 0x3aa   :  { %2392 = vmatpush3.bf16.xpose.msra.mxu0 %v420_v54  ;;  %2393 = vmatprep.mubr.msk.bf16.mxu0 %vm2801_vm0, %v2800_v0 }
 0x3ab   :  { %2403 = vmatprep.subr.bf16.mxu0 %v2800_v0 }
 0x3ad   :  { %2388 = vmatmul.mubr.msk.bf16.vlgmr.msra.gmra.mrb[8].mxu1 %vm143_vm2, %v363_v55 }
 0x3ae   :  { %2399 = vmatprep.mubr.msk.bf16.mxu1 %vm2801_vm0, %v2800_v0 }
 0x3b1   :  { %2394 = vmatmul.mubr.msk.bf16.vlgmr.msra.gmra.mrb[12].mxu0 %vm143_vm2, %v413_v56 }
 0x3b2   :  { %2405 = vmatprep.mubr.msk.bf16.mxu0 %vm2801_vm0, %v2800_v0 }
 0x478   :  { %v2968_v57 = vpop.f32.mrb[4].mxu1 }
 0x479   :  { %v2377_v58 = vpop.f32.mrb[5].mxu1 }
 0x47a   :  { %v311_v59 = vpop.f32.mrb[6].mxu1 }
 0x47b   :  { %v2378_v60 = vpop.f32.mrb[7].mxu1 }
 0x47c   :  { %v2970_v61 = vpop.f32.mrb[8].mxu0 }
 0x47d   :  { %v2383_v62 = vpop.f32.mrb[9].mxu0 }
 0x47e   :  { %v359_v63 = vpop.f32.mrb[10].mxu0 }
 0x47f   :  { %v2384_v1 = vpop.f32.mrb[11].mxu0 }
 0x480   :  { %v406_v2 = vpop.f32.mrb[8].mxu1 }
 0x481   :  { %v462_v3 = vmul.f32 0.35355338, %v406_v2  ;;  %v2389_v4 = vpop.f32.mrb[9].mxu1 }
 0x482   :  { %v409_v5 = vpop.f32.mrb[10].mxu1 }
 0x483   :  { %v2390_v6 = vpop.f32.mrb[11].mxu1  ;;  %v464_v7 = vsel %vm143_vm2, %v462_v3, -inf }
 0x484   :  { %465 = vmax.xlane.f32.xlu1 %v464_v7  ;;  %v456_v8 = vpop.f32.mrb[12].mxu0 }
 0x485   :  { %v463_v10 = vmul.f32 0.35355338, %v456_v8  ;;  %v2395_v11 = vpop.f32.mrb[13].mxu0 }
 0x486   :  { %v459_v13 = vpop.f32.mrb[14].mxu0 }
 0x487   :  { %v2396_v14 = vpop.f32.mrb[15].mxu0  ;;  %v467_v15 = vsel %vm143_vm2, %v463_v10, -inf }
 0x488   :  { %468 = vmax.xlane.f32.xlu0 %v467_v15 }
 0x495   :  { %488 = vrot.lane.b32.xlu1 %v2912_v9, %s2805_s9 }
 0x499   :  { %586 = vrot.lane.b32.xlu1 %v2912_v9, %s2806_s10 }
 0x49e   :  { %536 = vrot.lane.b32.xlu0 %v2916_v12, %s2805_s9 }
 0x4a2   :  { %584 = vrot.lane.b32.xlu0 %v2912_v9, %s2807_s11 }
 0x511   :  { %v466_v16 = vpop.xlane.xlu1 %465 }
 0x512   :  { %v470_v17 = vsub.f32 %v462_v3, %v466_v16 }
 0x514   :  { %v472_v18 = vmul.f32 1.442695, %v470_v17 }
 0x515   :  { %v489_v19 = vpop.permute.xlu1 %488  ;;  %v469_v20 = vpop.xlane.xlu0 %468 }
 0x516   :  { %2645 = vpow2.f32 %v472_v18  ;;  %v494_v21 = vsel %vm270_vm3, %v489_v19, 0  ;;  %v471_v22 = vsub.f32 %v463_v10, %v469_v20 }
 0x517   :  { %2398 = vmatpush3.bf16.msra.mxu1 %v494_v21 }
 0x518   :  { %v474_v23 = vmul.f32 1.442695, %v471_v22  ;;  %2409 = vmatprep.subr.bf16.mxu1 %v2800_v0 }
 0x519   :  { %v537_v24 = vpop.permute.xlu0 %536  ;;  %v587_v30 = vpop.permute.xlu1 %586 }
 0x51a   :  { %2647 = vpow2.f32 %v474_v23  ;;  %v542_v25 = vsel %vm270_vm3, %v537_v24, 0  ;;  %v592_v37 = vsel %vm143_vm2, %v587_v30, 0 }
 0x51b   :  { %2404 = vmatpush3.bf16.msra.mxu0 %v542_v25 }
 0x51c   :  { %2415 = vmatprep.subr.bf16.mxu0 %v2800_v0 }
 0x51d   :  { %v585_v42 = vpop.permute.xlu0 %584 }
 0x520   :  { %v2646_v26 = vpop.eup %2645 }
 0x521   :  { %v476_v27 = vsel %vm143_vm2, %v2646_v26, 0.0 }
 0x522   :  { %477 = vadd.xlane.f32.xlu1 %v476_v27 }
 0x524   :  { %v2648_v28 = vpop.eup %2647 }
 0x525   :  { %v479_v29 = vsel %vm143_vm2, %v2648_v28, 0.0 }
 0x526   :  { %480 = vadd.xlane.f32.xlu1 %v479_v29 }
 0x537   :  { %636 = vrot.lane.b32.xlu1 %v2916_v12, %s2806_s10 }
 0x53b   :  { %634 = vrot.lane.b32.xlu1 %v2916_v12, %s2807_s11 }
 0x5af   :  { %v478_v31 = vpop.xlane.xlu1 %477 }
 0x5b0   :  { %2649 = vrcp.f32 %v478_v31 }
 0x5b3   :  { %v481_v32 = vpop.xlane.xlu1 %480 }
 0x5b4   :  { %2651 = vrcp.f32 %v481_v32 }
 0x5b7   :  { %v637_v39 = vpop.permute.xlu1 %636 }
 0x5b8   :  { %v642_v41 = vsel %vm143_vm2, %v637_v39, 0 }
 0x5ba   :  { %v2650_v33 = vpop.eup %2649 }
 0x5bb   :  { %v484_v34 = vmul.f32 %v2650_v33, %v2646_v26  ;;  %v635_v43 = vpop.permute.xlu1 %634 }
 0x5bd   :  { %v486_v35 = vpack.c.bf16 %v484_v34, %v484_v34 }
 0x5be   :  { %v2652_v36 = vpop.eup %2651 }
 0x5bf   :  { %v485_v38 = vmul.f32 %v2652_v36, %v2648_v28  ;;  %2400 = vmatmul.mubr.msk.bf16.vlgmr.msra.gmra.mrb[12].mxu1 %vm143_vm2, %v486_v35 }
 0x5c0   :  { %2410 = vmatpush3.bf16.xpose.msra.mxu1 %v592_v37  ;;  %2411 = vmatprep.mubr.msk.bf16.mxu1 %vm2801_vm0, %v2800_v0 }
 0x5c1   :  { %v487_v40 = vpack.c.bf16 %v485_v38, %v485_v38  ;;  %2421 = vmatprep.subr.bf16.mxu1 %v2800_v0 }
 0x5c3   :  { %2406 = vmatmul.mubr.msk.bf16.vlgmr.msra.gmra.mrb[16].mxu0 %vm143_vm2, %v487_v40 }
 0x5c4   :  { %2416 = vmatpush3.bf16.xpose.msra.mxu0 %v642_v41  ;;  %2417 = vmatprep.mubr.msk.bf16.mxu0 %vm2801_vm0, %v2800_v0 }
 0x5c5   :  { %2427 = vmatprep.subr.bf16.mxu0 %v2800_v0 }
 0x5c7   :  { %2412 = vmatmul.mubr.msk.bf16.vlgmr.msra.gmra.mrb[16].mxu1 %vm143_vm2, %v585_v42 }
 0x5c8   :  { %2423 = vmatprep.mubr.msk.bf16.mxu1 %vm2801_vm0, %v2800_v0 }
 0x5cb   :  { %2418 = vmatmul.mubr.msk.bf16.vlgmr.msra.gmra.mrb[20].mxu0 %vm143_vm2, %v635_v43 }
 0x5cc   :  { %2429 = vmatprep.mubr.msk.bf16.mxu0 %vm2801_vm0, %v2800_v0 }
 0x692   :  { %v3008_v44 = vpop.f32.mrb[12].mxu1 }
 0x693   :  { %v2401_v45 = vpop.f32.mrb[13].mxu1 }
 0x694   :  { %v533_v46 = vpop.f32.mrb[14].mxu1 }
 0x695   :  { %v2402_v47 = vpop.f32.mrb[15].mxu1 }
 0x696   :  { %v3010_v48 = vpop.f32.mrb[16].mxu0 }
 0x697   :  { %v2598_v49 = vpack.i.bf16 %v3010_v48, %v3008_v44  ;;  %v2407_v50 = vpop.f32.mrb[17].mxu0 }
 0x698   :  { %v581_v51 = vpop.f32.mrb[18].mxu0 }
 0x699   :  { %v2408_v52 = vpop.f32.mrb[19].mxu0 }
 0x69a   :  { %v628_v53 = vpop.f32.mrb[16].mxu1 }
 0x69b   :  { %v684_v54 = vmul.f32 0.35355338, %v628_v53  ;;  %v2413_v55 = vpop.f32.mrb[17].mxu1 }
 0x69c   :  { %v631_v56 = vpop.f32.mrb[18].mxu1 }
 0x69d   :  { %v2414_v58 = vpop.f32.mrb[19].mxu1  ;;  %v686_v59 = vsel %vm143_vm2, %v684_v54, -inf }
 0x69e   :  { %687 = vmax.xlane.f32.xlu0 %v686_v59  ;;  %v678_v60 = vpop.f32.mrb[20].mxu0 }
 0x69f   :  { %v685_v62 = vmul.f32 0.35355338, %v678_v60  ;;  %v2419_v63 = vpop.f32.mrb[21].mxu0 }
 0x6a0   :  { %v681_v1 = vpop.f32.mrb[22].mxu0 }
 0x6a1   :  { %v2420_v2 = vpop.f32.mrb[23].mxu0  ;;  %v689_v3 = vsel %vm143_vm2, %v685_v62, -inf }
 0x6a2   :  { %690 = vmax.xlane.f32.xlu1 %v689_v3 }
 0x6b3   :  { %710 = vrot.lane.b32.xlu1 %v2912_v9, %s2808_s12 }
 0x6b7   :  { %808 = vrot.lane.b32.xlu1 %v2912_v9, %s2809_s13 }
 0x6bb   :  { %858 = vrot.lane.b32.xlu1 %v2916_v12, %s2809_s13 }
 0x6bf   :  { %856 = vrot.lane.b32.xlu1 %v2916_v12, %s2810_s14 }
 0x72b   :  { %v688_v4 = vpop.xlane.xlu0 %687 }
 0x72c   :  { %v692_v5 = vsub.f32 %v684_v54, %v688_v4 }
 0x72e   :  { %v694_v6 = vmul.f32 1.442695, %v692_v5 }
 0x72f   :  { %v691_v7 = vpop.xlane.xlu1 %690 }
 0x730   :  { %2653 = vpow2.f32 %v694_v6  ;;  %v693_v8 = vsub.f32 %v685_v62, %v691_v7 }
 0x732   :  { %v696_v10 = vmul.f32 1.442695, %v693_v8 }
 0x733   :  { %v711_v11 = vpop.permute.xlu1 %710 }
 0x734   :  { %2655 = vpow2.f32 %v696_v10  ;;  %v716_v13 = vsel %vm270_vm3, %v711_v11, 0 }
 0x735   :  { %2422 = vmatpush3.bf16.msra.mxu1 %v716_v13 }
 0x736   :  { %2433 = vmatprep.subr.bf16.mxu1 %v2800_v0 }
 0x737   :  { %v809_v23 = vpop.permute.xlu1 %808 }
 0x738   :  { %v814_v27 = vsel %vm143_vm2, %v809_v23, 0 }
 0x73a   :  { %v2654_v14 = vpop.eup %2653 }
 0x73b   :  { %v698_v15 = vsel %vm143_vm2, %v2654_v14, 0.0  ;;  %v859_v29 = vpop.permute.xlu1 %858 }
 0x73c   :  { %699 = vadd.xlane.f32.xlu0 %v698_v15  ;;  %v864_v31 = vsel %vm143_vm2, %v859_v29, 0 }
 0x73e   :  { %v2656_v16 = vpop.eup %2655 }
 0x73f   :  { %v701_v17 = vsel %vm143_vm2, %v2656_v16, 0.0  ;;  %v857_v33 = vpop.permute.xlu1 %856 }
 0x740   :  { %702 = vadd.xlane.f32.xlu0 %v701_v17  ;;  %v2632_v17 = vld [vmem:[#allocation7 + $0x8] sm:$0xff]  }
 0x756   :  { %758 = vrot.lane.b32.xlu0 %v2916_v12, %s2808_s12 }
 0x75a   :  { %806 = vrot.lane.b32.xlu0 %v2912_v9, %s2810_s14 }
 0x7c9   :  { %v700_v18 = vpop.xlane.xlu0 %699 }
 0x7ca   :  { %2657 = vrcp.f32 %v700_v18 }
 0x7cd   :  { %v703_v19 = vpop.xlane.xlu0 %702 }
 0x7ce   :  { %2659 = vrcp.f32 %v703_v19 }
 0x7d1   :  { %v759_v20 = vpop.permute.xlu0 %758 }
 0x7d2   :  { %v764_v21 = vsel %vm270_vm3, %v759_v20, 0 }
 0x7d3   :  { %2428 = vmatpush3.bf16.msra.mxu0 %v764_v21 }
 0x7d4   :  { %v2658_v22 = vpop.eup %2657  ;;  %2439 = vmatprep.subr.bf16.mxu0 %v2800_v0 }
 0x7d5   :  { %v706_v24 = vmul.f32 %v2658_v22, %v2654_v14  ;;  %v807_v32 = vpop.permute.xlu0 %806 }
 0x7d7   :  { %v708_v25 = vpack.c.bf16 %v706_v24, %v706_v24 }
 0x7d8   :  { %v2660_v26 = vpop.eup %2659 }
 0x7d9   :  { %v707_v28 = vmul.f32 %v2660_v26, %v2656_v16  ;;  %2424 = vmatmul.mubr.msk.bf16.vlgmr.msra.gmra.mrb[20].mxu1 %vm143_vm2, %v708_v25  ;;  %v2631_v16 = vld [vmem:[#allocation7] sm:$0xff]  }
 0x7da   :  { %2434 = vmatpush3.bf16.xpose.msra.mxu1 %v814_v27  ;;  %2435 = vmatprep.mubr.msk.bf16.mxu1 %vm2801_vm0, %v2800_v0 }
 0x7db   :  { %v709_v30 = vpack.c.bf16 %v707_v28, %v707_v28  ;;  %2445 = vmatprep.subr.bf16.mxu1 %v2800_v0 }
 0x7dd   :  { %2430 = vmatmul.mubr.msk.bf16.vlgmr.msra.gmra.mrb[24].mxu0 %vm143_vm2, %v709_v30 }
 0x7de   :  { %2440 = vmatpush3.bf16.xpose.msra.mxu0 %v864_v31  ;;  %2441 = vmatprep.mubr.msk.bf16.mxu0 %vm2801_vm0, %v2800_v0 }
 0x7df   :  { %2451 = vmatprep.subr.bf16.mxu0 %v2800_v0 }
 0x7e1   :  { %2436 = vmatmul.mubr.msk.bf16.vlgmr.msra.gmra.mrb[24].mxu1 %vm143_vm2, %v807_v32 }
 0x7e2   :  { %2447 = vmatprep.mubr.msk.bf16.mxu1 %vm2801_vm0, %v2800_v0 }
 0x7e5   :  { %2442 = vmatmul.mubr.msk.bf16.vlgmr.msra.gmra.mrb[28].mxu0 %vm143_vm2, %v857_v33 }
 0x7e6   :  { %2453 = vmatprep.mubr.msk.bf16.mxu0 %vm2801_vm0, %v2800_v0 }
 0x8ac   :  { %v752_v34 = vpop.f32.mrb[20].mxu1 }
 0x8ad   :  { %v2425_v35 = vpop.f32.mrb[21].mxu1 }
 0x8ae   :  { %v755_v36 = vpop.f32.mrb[22].mxu1 }
 0x8af   :  { %v2426_v37 = vpop.f32.mrb[23].mxu1 }
 0x8b0   :  { %v800_v38 = vpop.f32.mrb[24].mxu0 }
 0x8b1   :  { %v2603_v39 = vpack.i.bf16 %v800_v38, %v752_v34  ;;  %v2431_v40 = vpop.f32.mrb[25].mxu0 }
 0x8b2   :  { %v803_v41 = vpop.f32.mrb[26].mxu0 }
 0x8b3   :  { %v2432_v42 = vpop.f32.mrb[27].mxu0 }
 0x8b4   :  { %v850_v43 = vpop.f32.mrb[24].mxu1 }
 0x8b5   :  { %v906_v45 = vmul.f32 0.35355338, %v850_v43  ;;  %v2437_v46 = vpop.f32.mrb[25].mxu1  ;;  %v2247_v43 = vld [vmem:[%s3288_s4] ss:$0 sm:$0xff] }
 0x8b6   :  { %v853_v47 = vpop.f32.mrb[26].mxu1 }
 0x8b7   :  { %v2438_v50 = vpop.f32.mrb[27].mxu1  ;;  %v908_v51 = vsel %vm143_vm2, %v906_v45, -inf }
 0x8b8   :  { %909 = vmax.xlane.f32.xlu0 %v908_v51  ;;  %v900_v52 = vpop.f32.mrb[28].mxu0 }
 0x8b9   :  { %v907_v53 = vmul.f32 0.35355338, %v900_v52  ;;  %v2443_v54 = vpop.f32.mrb[29].mxu0 }
 0x8ba   :  { %v903_v55 = vpop.f32.mrb[30].mxu0  ;;  %v2252_v54 = vld [vmem:[%s3286_s2 + $0x1] ss:$0 sm:$0xff] }
 0x8bb   :  { %v2444_v56 = vpop.f32.mrb[31].mxu0  ;;  %v911_v58 = vsel %vm143_vm2, %v907_v53, -inf }
 0x8bc   :  { %912 = vmax.xlane.f32.xlu1 %v911_v58 }
 0x8cd   :  { %932 = vrot.lane.b32.xlu1 %v2912_v9, %s2811_s15 }
 0x8d1   :  { %2599 = vrot.lane.b32.xlu1 %v2598_v49, %s2812_s16 }
 0x8d5   :  { %2604 = vrot.lane.b32.xlu1 %v2603_v39, %s2813_s1 }
 0x945   :  { %v910_v59 = vpop.xlane.xlu0 %909 }
 0x946   :  { %v914_v60 = vsub.f32 %v906_v45, %v910_v59 }
 0x948   :  { %v916_v62 = vmul.f32 1.442695, %v914_v60 }
 0x949   :  { %v913_v63 = vpop.xlane.xlu1 %912 }
 0x94a   :  { %2661 = vpow2.f32 %v916_v62  ;;  %v915_v1 = vsub.f32 %v907_v53, %v913_v63 }
 0x94c   :  { %v918_v2 = vmul.f32 1.442695, %v915_v1 }
 0x94d   :  { %v933_v3 = vpop.permute.xlu1 %932 }
 0x94e   :  { %2663 = vpow2.f32 %v918_v2  ;;  %v938_v9 = vsel %vm270_vm3, %v933_v3, 0 }
 0x94f   :  { %2446 = vmatpush3.bf16.msra.mxu1 %v938_v9 }
 0x950   :  { %2457 = vmatprep.subr.bf16.mxu1 %v2800_v0 }
 0x951   :  { %v2600_v27 = vpop.permute.xlu1 %2599 }
 0x952   :  { %v2602_v29 = vunpack.i.h.bf16 %v2600_v27  ;;  %v2601_v30 = vunpack.i.l.bf16 %v2600_v27 }
 0x954   :  { %v2662_v4 = vpop.eup %2661  ;;  %v1053_v34 = vsel %vm143_vm2, %v2970_v61, %v2602_v29  ;;  %v1052_v35 = vsel %vm143_vm2, %v2968_v57, %v2601_v30  ;;  %v2633_v61 = vld [vmem:[#allocation5 + $0x10] sm:$0xff]   ;;  %v2634_v57 = vld [vmem:[#allocation5 + $0x18] sm:$0xff]  }
 0x955   :  { %v920_v44 = vsel %vm143_vm2, %v2662_v4, 0.0  ;;  %v2605_v28 = vpop.permute.xlu1 %2604 }
 0x956   :  { %921 = vadd.xlane.f32.xlu0 %v920_v44  ;;  %v2607_v31 = vunpack.i.h.bf16 %v2605_v28  ;;  %v2606_v32 = vunpack.i.l.bf16 %v2605_v28 }
 0x958   :  { %v2664_v48 = vpop.eup %2663  ;;  %v1055_v38 = vsel %vm1054_vm4, %v1052_v35, %v2606_v32  ;;  %v1056_v39 = vsel %vm1054_vm4, %v1053_v34, %v2607_v31 }
 0x959   :  { %v923_v49 = vsel %vm143_vm2, %v2664_v48, 0.0 }
 0x95a   :  { %924 = vadd.xlane.f32.xlu0 %v923_v49 }
 0x970   :  { %980 = vrot.lane.b32.xlu0 %v2916_v12, %s2811_s15 }
 0x9e3   :  { %v922_v5 = vpop.xlane.xlu0 %921 }
 0x9e4   :  { %2665 = vrcp.f32 %v922_v5 }
 0x9e7   :  { %v925_v6 = vpop.xlane.xlu0 %924 }
 0x9e8   :  { %2667 = vrcp.f32 %v925_v6 }
 0x9eb   :  { %v981_v7 = vpop.permute.xlu0 %980 }
 0x9ec   :  { %v986_v8 = vsel %vm270_vm3, %v981_v7, 0 }
 0x9ed   :  { %2452 = vmatpush3.bf16.msra.mxu0 %v986_v8 }
 0x9ee   :  { %v2666_v10 = vpop.eup %2665  ;;  %2465 = vmatprep.subr.bf16.mxu0 %v2800_v0 }
 0x9ef   :  { %v928_v11 = vmul.f32 %v2666_v10, %v2662_v4 }
 0x9f1   :  { %v930_v13 = vpack.c.bf16 %v928_v11, %v928_v11 }
 0x9f2   :  { %v2668_v14 = vpop.eup %2667 }
 0x9f3   :  { %v929_v15 = vmul.f32 %v2668_v14, %v2664_v48  ;;  %2448 = vmatmul.mubr.msk.bf16.vlgmr.msra.gmra.mrb[28].mxu1 %vm143_vm2, %v930_v13 }
 0x9f4   :  { %2461 = vmatprep.mubr.msk.bf16.mxu1 %vm2801_vm0, %v2800_v0  ;;  %2458 = vmatpush3.bf16.msra.mxu1 %v2631_v16 }
 0x9f5   :  { %v931_v12 = vpack.c.bf16 %v929_v15, %v929_v15  ;;  %2459 = vmatprep.subr.bf16.mxu1 %v2800_v0 }
 0x9f7   :  { %2454 = vmatmul.mubr.msk.bf16.vlgmr.msra.gmra.mrb[32].mxu0 %vm143_vm2, %v931_v12 }
 0x9f8   :  { %2469 = vmatprep.mubr.msk.bf16.mxu0 %vm2801_vm0, %v2800_v0  ;;  %2460 = vmatpush3.bf16.msra.mxu1 %v2632_v17 }
 0x9f9   :  { %2473 = vmatprep.subr.bf16.mxu1 %v2800_v0  ;;  %2466 = vmatpush3.bf16.msra.mxu0 %v2633_v61 }
 0x9fa   :  { %2467 = vmatprep.subr.bf16.mxu0 %v2800_v0 }
 0x9fd   :  { %2468 = vmatpush3.bf16.msra.mxu0 %v2634_v57 }
 0x9fe   :  { %2479 = vmatprep.subr.bf16.mxu0 %v2800_v0 }
 0xac6   :  { %v974_v18 = vpop.f32.mrb[28].mxu1 }
 0xac7   :  { %v2449_v19 = vpop.f32.mrb[29].mxu1 }
 0xac8   :  { %v977_v20 = vpop.f32.mrb[30].mxu1 }
 0xac9   :  { %v2450_v21 = vpop.f32.mrb[31].mxu1 }
 0xaca   :  { %v1022_v22 = vpop.f32.mrb[32].mxu0 }
 0xacb   :  { %v2608_v23 = vpack.i.bf16 %v1022_v22, %v974_v18  ;;  %v2455_v24 = vpop.f32.mrb[33].mxu0 }
 0xacc   :  { %v1025_v25 = vpop.f32.mrb[34].mxu0 }
 0xacd   :  { %2609 = vrot.lane.b32.xlu0 %v2608_v23, %s2814_s17  ;;  %v2456_v26 = vpop.f32.mrb[35].mxu0 }
 0xb3f   :  { %v2610_v33 = vpop.permute.xlu0 %2609 }
 0xb40   :  { %v2612_v36 = vunpack.i.h.bf16 %v2610_v33  ;;  %v2611_v37 = vunpack.i.l.bf16 %v2610_v33 }
 0xb42   :  { %v1059_v40 = vsel %vm1057_vm5, %v1056_v39, %v2612_v36  ;;  %v1058_v41 = vsel %vm1057_vm5, %v1055_v38, %v2611_v37 }
 0xb43   :  { %v1060_v42 = vpack.c.bf16 %v1059_v40, %v1058_v41 }
 0xb45   :  { %2462 = vmatmul.mubr.msk.bf16.vlgmr.msra.gmra.mrb[32].mxu1 %vm93_vm1, %v1060_v42 }
 0xb46   :  { %2475 = vmatprep.mubr.msk.bf16.mxu1 %vm2801_vm0, %v2800_v0 }
 0xc18   :  { %v1121_v45 = vpop.f32.mrb[32].mxu1 }
 0xc19   :  { %v2463_v46 = vpop.f32.mrb[33].mxu1  ;;  %v1122_v50 = vadd.f32 %v2247_v43, %v1121_v45 }
 0xc1a   :  { %v1124_v47 = vpop.f32.mrb[34].mxu1 }
 0xc1b   :  { %v1125_v51 = vadd.f32 %v2247_v43, %v1124_v47  ;;  %v2464_v52 = vpop.f32.mrb[35].mxu1 }
 0xc1d   :  { %v1128_v53 = vpack.c.bf16 %v1125_v51, %v1122_v50 }
 0xc1f   :  { %2470 = vmatmul.mubr.msk.bf16.vlgmr.msra.gmra.mrb[36].mxu0 %vm93_vm1, %v1128_v53 }
 0xc20   :  { %2481 = vmatprep.mubr.msk.bf16.mxu0 %vm2801_vm0, %v2800_v0 }
 0xcf2   :  { %v1191_v55 = vpop.f32.mrb[36].mxu0 }
 0xcf3   :  { %v1192_v56 = vadd.f32 %v2252_v54, %v1191_v55  ;;  %v2471_v58 = vpop.f32.mrb[37].mxu0 }
 0xcf4   :  { %v1194_v59 = vpop.f32.mrb[38].mxu0 }
 0xcf5   :  { %v3098_v60 = vpack.c.bf16 %v1192_v56, %v1192_v56  ;;  %v1195_v62 = vadd.f32 %v2252_v54, %v1194_v59  ;;  %v2472_v63 = vpop.f32.mrb[39].mxu0 }
 0xcf7   :  { %v3100_v1 = vpack.c.bf16 %v1195_v62, %v1195_v62  ;;  %1201 = vrot.lane.b32.xlu1 %v3098_v60, %s2802_s6 }
 0xcf9   :  { %1250 = vrot.lane.b32.xlu0 %v3100_v1, %s2802_s6 }
 0xd69   :  { %v1202_v2 = vpop.permute.xlu1 %1201 }
 0xd6a   :  { %v1207_v3 = vsel %vm143_vm2, %v1202_v2, 0 }
 0xd6b   :  { %2474 = vmatpush3.bf16.xpose.msra.mxu1 %v1207_v3  ;;  %v1251_v9 = vpop.permute.xlu0 %1250 }
 0xd6c   :  { %v1256_v4 = vsel %vm143_vm2, %v1251_v9, 0  ;;  %2485 = vmatprep.subr.bf16.mxu1 %v2800_v0 }
 0xd6d   :  { %2480 = vmatpush3.bf16.xpose.msra.mxu0 %v1256_v4 }
 0xd6e   :  { %2491 = vmatprep.subr.bf16.mxu0 %v2800_v0 }
 0xd72   :  { %2476 = vmatmul.mubr.msk.bf16.vlgmr.msra.gmra.mrb[36].mxu1 %vm143_vm2, %v3098_v60 }
 0xd73   :  { %2487 = vmatprep.mubr.msk.bf16.mxu1 %vm2801_vm0, %v2800_v0 }
 0xd74   :  { %2482 = vmatmul.mubr.msk.bf16.vlgmr.msra.gmra.mrb[40].mxu0 %vm143_vm2, %v3100_v1 }
 0xd75   :  { %2493 = vmatprep.mubr.msk.bf16.mxu0 %vm2801_vm0, %v2800_v0 }
 0xe45   :  { %v1243_v44 = vpop.f32.mrb[36].mxu1 }
 0xe46   :  { %v1298_v48 = vmul.f32 0.35355338, %v1243_v44  ;;  %v2477_v49 = vpop.f32.mrb[37].mxu1 }
 0xe47   :  { %v1246_v5 = vpop.f32.mrb[38].mxu1  ;;  %v1292_v6 = vpop.f32.mrb[40].mxu0 }
 0xe48   :  { %v1299_v7 = vmul.f32 0.35355338, %v1292_v6  ;;  %v2478_v8 = vpop.f32.mrb[39].mxu1  ;;  %v2483_v10 = vpop.f32.mrb[41].mxu0  ;;  %v1300_v11 = vsel %vm143_vm2, %v1298_v48, -inf }
 0xe49   :  { %1301 = vmax.xlane.f32.xlu1 %v1300_v11  ;;  %v1295_v13 = vpop.f32.mrb[42].mxu0 }
 0xe4a   :  { %v2484_v14 = vpop.f32.mrb[43].mxu0  ;;  %v1303_v15 = vsel %vm143_vm2, %v1299_v7, -inf }
 0xe4b   :  { %1304 = vmax.xlane.f32.xlu0 %v1303_v15 }
 0xe5a   :  { %1372 = vrot.lane.b32.xlu1 %v3100_v1, %s2797_s30 }
 0xe61   :  { %1324 = vrot.lane.b32.xlu0 %v3098_v60, %s2797_s30 }
 0xed6   :  { %v1302_v12 = vpop.xlane.xlu1 %1301 }
 0xed7   :  { %v1306_v16 = vsub.f32 %v1298_v48, %v1302_v12 }
 0xed8   :  { %v1305_v17 = vpop.xlane.xlu0 %1304 }
 0xed9   :  { %v1308_v18 = vmul.f32 1.442695, %v1306_v16  ;;  %v1307_v19 = vsub.f32 %v1299_v7, %v1305_v17 }
 0xeda   :  { %v1373_v20 = vpop.permute.xlu1 %1372 }
 0xedb   :  { %2669 = vpow2.f32 %v1308_v18  ;;  %v1310_v21 = vmul.f32 1.442695, %v1307_v19  ;;  %v1378_v22 = vsel %vm270_vm3, %v1373_v20, 0 }
 0xedc   :  { %2492 = vmatpush3.bf16.msra.mxu0 %v1378_v22  ;;  %v1325_v23 = vpop.permute.xlu0 %1324 }
 0xedd   :  { %2671 = vpow2.f32 %v1310_v21  ;;  %v1330_v24 = vsel %vm270_vm3, %v1325_v23, 0  ;;  %2503 = vmatprep.subr.bf16.mxu0 %v2800_v0 }
 0xede   :  { %2486 = vmatpush3.bf16.msra.mxu1 %v1330_v24 }
 0xedf   :  { %2497 = vmatprep.subr.bf16.mxu1 %v2800_v0 }
 0xee5   :  { %v2670_v25 = vpop.eup %2669 }
 0xee6   :  { %v1312_v26 = vsel %vm143_vm2, %v2670_v25, 0.0 }
 0xee7   :  { %v2672_v27 = vpop.eup %2671  ;;  %1313 = vadd.xlane.f32.xlu0 %v1312_v26 }
 0xee8   :  { %v1315_v28 = vsel %vm143_vm2, %v2672_v27, 0.0 }
 0xee9   :  { %1316 = vadd.xlane.f32.xlu1 %v1315_v28 }
 0xefa   :  { %1422 = vrot.lane.b32.xlu1 %v3098_v60, %s2803_s7 }
 0xefd   :  { %1472 = vrot.lane.b32.xlu0 %v3100_v1, %s2803_s7 }
 0xefe   :  { %1420 = vrot.lane.b32.xlu1 %v3098_v60, %s2804_s8 }
 0xf01   :  { %1470 = vrot.lane.b32.xlu0 %v3100_v1, %s2804_s8 }
 0xf74   :  { %v1314_v29 = vpop.xlane.xlu0 %1313 }
 0xf75   :  { %2673 = vrcp.f32 %v1314_v29 }
 0xf76   :  { %v1317_v30 = vpop.xlane.xlu1 %1316 }
 0xf77   :  { %2675 = vrcp.f32 %v1317_v30 }
 0xf78   :  { %v1473_v37 = vpop.permute.xlu0 %1472 }
 0xf79   :  { %v1478_v40 = vsel %vm143_vm2, %v1473_v37, 0 }
 0xf7a   :  { %v1423_v34 = vpop.permute.xlu1 %1422 }
 0xf7b   :  { %v1428_v38 = vsel %vm143_vm2, %v1423_v34, 0 }
 0xf7c   :  { %v1471_v42 = vpop.permute.xlu0 %1470 }
 0xf7e   :  { %v1421_v41 = vpop.permute.xlu1 %1420 }
 0xf7f   :  { %v2674_v31 = vpop.eup %2673 }
 0xf80   :  { %v1320_v32 = vmul.f32 %v2674_v31, %v2670_v25 }
 0xf81   :  { %v2676_v33 = vpop.eup %2675 }
 0xf82   :  { %v1321_v35 = vmul.f32 %v2676_v33, %v2672_v27  ;;  %v1322_v36 = vpack.c.bf16 %v1320_v32, %v1320_v32 }
 0xf84   :  { %2488 = vmatmul.mubr.msk.bf16.vlgmr.msra.gmra.mrb[40].mxu1 %vm143_vm2, %v1322_v36  ;;  %v1323_v39 = vpack.c.bf16 %v1321_v35, %v1321_v35 }
 0xf85   :  { %2498 = vmatpush3.bf16.xpose.msra.mxu1 %v1428_v38  ;;  %2499 = vmatprep.mubr.msk.bf16.mxu1 %vm2801_vm0, %v2800_v0 }
 0xf86   :  { %2494 = vmatmul.mubr.msk.bf16.vlgmr.msra.gmra.mrb[44].mxu0 %vm143_vm2, %v1323_v39  ;;  %2509 = vmatprep.subr.bf16.mxu1 %v2800_v0 }
 0xf87   :  { %2504 = vmatpush3.bf16.xpose.msra.mxu0 %v1478_v40  ;;  %2505 = vmatprep.mubr.msk.bf16.mxu0 %vm2801_vm0, %v2800_v0 }
 0xf88   :  { %2515 = vmatprep.subr.bf16.mxu0 %v2800_v0 }
 0xf8c   :  { %2500 = vmatmul.mubr.msk.bf16.vlgmr.msra.gmra.mrb[44].mxu1 %vm143_vm2, %v1421_v41 }
 0xf8d   :  { %2511 = vmatprep.mubr.msk.bf16.mxu1 %vm2801_vm0, %v2800_v0 }
 0xf8e   :  { %2506 = vmatmul.mubr.msk.bf16.vlgmr.msra.gmra.mrb[48].mxu0 %vm143_vm2, %v1471_v42 }
 0xf8f   :  { %2517 = vmatprep.mubr.msk.bf16.mxu0 %vm2801_vm0, %v2800_v0 }
0x1057   :  { %v3154_v61 = vpop.f32.mrb[40].mxu1 }
0x1058   :  { %v2489_v57 = vpop.f32.mrb[41].mxu1 }
0x1059   :  { %v1369_v43 = vpop.f32.mrb[42].mxu1  ;;  %v3156_v45 = vpop.f32.mrb[44].mxu0 }
0x105a   :  { %v2490_v46 = vpop.f32.mrb[43].mxu1  ;;  %v2495_v47 = vpop.f32.mrb[45].mxu0 }
0x105b   :  { %v1417_v50 = vpop.f32.mrb[46].mxu0 }
0x105c   :  { %v2496_v51 = vpop.f32.mrb[47].mxu0 }
0x105f   :  { %v1464_v52 = vpop.f32.mrb[44].mxu1 }
0x1060   :  { %v1520_v53 = vmul.f32 0.35355338, %v1464_v52  ;;  %v2501_v54 = vpop.f32.mrb[45].mxu1 }
0x1061   :  { %v1467_v55 = vpop.f32.mrb[46].mxu1  ;;  %v1514_v56 = vpop.f32.mrb[48].mxu0 }
0x1062   :  { %v1521_v58 = vmul.f32 0.35355338, %v1514_v56  ;;  %v2502_v59 = vpop.f32.mrb[47].mxu1  ;;  %v2507_v62 = vpop.f32.mrb[49].mxu0  ;;  %v1522_v63 = vsel %vm143_vm2, %v1520_v53, -inf }
0x1063   :  { %1523 = vmax.xlane.f32.xlu1 %v1522_v63  ;;  %v1517_v2 = vpop.f32.mrb[50].mxu0 }
0x1064   :  { %v2508_v3 = vpop.f32.mrb[51].mxu0  ;;  %v1525_v9 = vsel %vm143_vm2, %v1521_v58, -inf }
0x1065   :  { %1526 = vmax.xlane.f32.xlu0 %v1525_v9 }
0x1074   :  { %1594 = vrot.lane.b32.xlu1 %v3100_v1, %s2805_s9 }
0x107b   :  { %1546 = vrot.lane.b32.xlu0 %v3098_v60, %s2805_s9 }
0x10f0   :  { %v1524_v4 = vpop.xlane.xlu1 %1523 }
0x10f1   :  { %v1528_v44 = vsub.f32 %v1520_v53, %v1524_v4 }
0x10f2   :  { %v1527_v48 = vpop.xlane.xlu0 %1526 }
0x10f3   :  { %v1530_v49 = vmul.f32 1.442695, %v1528_v44  ;;  %v1529_v5 = vsub.f32 %v1521_v58, %v1527_v48 }
0x10f4   :  { %v1595_v6 = vpop.permute.xlu1 %1594 }
0x10f5   :  { %2677 = vpow2.f32 %v1530_v49  ;;  %v1532_v7 = vmul.f32 1.442695, %v1529_v5  ;;  %v1600_v8 = vsel %vm270_vm3, %v1595_v6, 0 }
0x10f6   :  { %2516 = vmatpush3.bf16.msra.mxu0 %v1600_v8  ;;  %v1547_v10 = vpop.permute.xlu0 %1546 }
0x10f7   :  { %2679 = vpow2.f32 %v1532_v7  ;;  %v1552_v11 = vsel %vm270_vm3, %v1547_v10, 0  ;;  %2527 = vmatprep.subr.bf16.mxu0 %v2800_v0 }
0x10f8   :  { %2510 = vmatpush3.bf16.msra.mxu1 %v1552_v11 }
0x10f9   :  { %2521 = vmatprep.subr.bf16.mxu1 %v2800_v0 }
0x10ff   :  { %v2678_v13 = vpop.eup %2677 }
0x1100   :  { %v1534_v14 = vsel %vm143_vm2, %v2678_v13, 0.0 }
0x1101   :  { %v2680_v15 = vpop.eup %2679  ;;  %1535 = vadd.xlane.f32.xlu0 %v1534_v14 }
0x1102   :  { %v1537_v12 = vsel %vm143_vm2, %v2680_v15, 0.0 }
0x1103   :  { %1538 = vadd.xlane.f32.xlu1 %v1537_v12 }
0x1114   :  { %1644 = vrot.lane.b32.xlu1 %v3098_v60, %s2806_s10 }
0x1117   :  { %1694 = vrot.lane.b32.xlu0 %v3100_v1, %s2806_s10 }
0x1118   :  { %1642 = vrot.lane.b32.xlu1 %v3098_v60, %s2807_s11 }
0x111b   :  { %1692 = vrot.lane.b32.xlu0 %v3100_v1, %s2807_s11 }
0x118e   :  { %v1536_v16 = vpop.xlane.xlu0 %1535 }
0x118f   :  { %2681 = vrcp.f32 %v1536_v16 }
0x1190   :  { %v1539_v17 = vpop.xlane.xlu1 %1538 }
0x1191   :  { %2683 = vrcp.f32 %v1539_v17 }
0x1192   :  { %v1695_v24 = vpop.permute.xlu0 %1694 }
0x1193   :  { %v1700_v27 = vsel %vm143_vm2, %v1695_v24, 0 }
0x1194   :  { %v1645_v21 = vpop.permute.xlu1 %1644 }
0x1195   :  { %v1650_v25 = vsel %vm143_vm2, %v1645_v21, 0 }
0x1196   :  { %v1693_v29 = vpop.permute.xlu0 %1692 }
0x1198   :  { %v1643_v28 = vpop.permute.xlu1 %1642 }
0x1199   :  { %v2682_v18 = vpop.eup %2681 }
0x119a   :  { %v1542_v19 = vmul.f32 %v2682_v18, %v2678_v13 }
0x119b   :  { %v2684_v20 = vpop.eup %2683 }
0x119c   :  { %v1543_v22 = vmul.f32 %v2684_v20, %v2680_v15  ;;  %v1544_v23 = vpack.c.bf16 %v1542_v19, %v1542_v19 }
0x119e   :  { %2512 = vmatmul.mubr.msk.bf16.vlgmr.msra.gmra.mrb[48].mxu1 %vm143_vm2, %v1544_v23  ;;  %v1545_v26 = vpack.c.bf16 %v1543_v22, %v1543_v22 }
0x119f   :  { %2522 = vmatpush3.bf16.xpose.msra.mxu1 %v1650_v25  ;;  %2523 = vmatprep.mubr.msk.bf16.mxu1 %vm2801_vm0, %v2800_v0 }
0x11a0   :  { %2518 = vmatmul.mubr.msk.bf16.vlgmr.msra.gmra.mrb[52].mxu0 %vm143_vm2, %v1545_v26  ;;  %2533 = vmatprep.subr.bf16.mxu1 %v2800_v0 }
0x11a1   :  { %2528 = vmatpush3.bf16.xpose.msra.mxu0 %v1700_v27  ;;  %2529 = vmatprep.mubr.msk.bf16.mxu0 %vm2801_vm0, %v2800_v0 }
0x11a2   :  { %2539 = vmatprep.subr.bf16.mxu0 %v2800_v0 }
0x11a6   :  { %2524 = vmatmul.mubr.msk.bf16.vlgmr.msra.gmra.mrb[52].mxu1 %vm143_vm2, %v1643_v28 }
0x11a7   :  { %2535 = vmatprep.mubr.msk.bf16.mxu1 %vm2801_vm0, %v2800_v0 }
0x11a8   :  { %2530 = vmatmul.mubr.msk.bf16.vlgmr.msra.gmra.mrb[56].mxu0 %vm143_vm2, %v1693_v29 }
0x11a9   :  { %2541 = vmatprep.mubr.msk.bf16.mxu0 %vm2801_vm0, %v2800_v0 }
0x1271   :  { %v3194_v30 = vpop.f32.mrb[48].mxu1 }
0x1272   :  { %v2513_v31 = vpop.f32.mrb[49].mxu1 }
0x1273   :  { %v1591_v32 = vpop.f32.mrb[50].mxu1  ;;  %v3196_v33 = vpop.f32.mrb[52].mxu0 }
0x1274   :  { %v2613_v34 = vpack.i.bf16 %v3196_v33, %v3194_v30  ;;  %v2514_v35 = vpop.f32.mrb[51].mxu1  ;;  %v2519_v36 = vpop.f32.mrb[53].mxu0 }
0x1275   :  { %v1639_v37 = vpop.f32.mrb[54].mxu0 }
0x1276   :  { %v2520_v38 = vpop.f32.mrb[55].mxu0 }
0x1279   :  { %v1686_v39 = vpop.f32.mrb[52].mxu1 }
0x127a   :  { %v1742_v40 = vmul.f32 0.35355338, %v1686_v39  ;;  %v2525_v41 = vpop.f32.mrb[53].mxu1 }
0x127b   :  { %v1689_v42 = vpop.f32.mrb[54].mxu1  ;;  %v1736_v57 = vpop.f32.mrb[56].mxu0 }
0x127c   :  { %v1743_v43 = vmul.f32 0.35355338, %v1736_v57  ;;  %v2526_v46 = vpop.f32.mrb[55].mxu1  ;;  %v2531_v47 = vpop.f32.mrb[57].mxu0  ;;  %v1744_v50 = vsel %vm143_vm2, %v1742_v40, -inf }
0x127d   :  { %1745 = vmax.xlane.f32.xlu1 %v1744_v50  ;;  %v1739_v51 = vpop.f32.mrb[58].mxu0 }
0x127e   :  { %v2532_v52 = vpop.f32.mrb[59].mxu0  ;;  %v1747_v53 = vsel %vm143_vm2, %v1743_v43, -inf }
0x127f   :  { %1748 = vmax.xlane.f32.xlu0 %v1747_v53 }
0x128e   :  { %1816 = vrot.lane.b32.xlu1 %v3100_v1, %s2808_s12 }
0x1295   :  { %1768 = vrot.lane.b32.xlu0 %v3098_v60, %s2808_s12 }
0x130a   :  { %v1746_v54 = vpop.xlane.xlu1 %1745 }
0x130b   :  { %v1750_v55 = vsub.f32 %v1742_v40, %v1746_v54 }
0x130c   :  { %v1749_v56 = vpop.xlane.xlu0 %1748 }
0x130d   :  { %v1752_v58 = vmul.f32 1.442695, %v1750_v55  ;;  %v1751_v59 = vsub.f32 %v1743_v43, %v1749_v56 }
0x130e   :  { %v1817_v62 = vpop.permute.xlu1 %1816 }
0x130f   :  { %2685 = vpow2.f32 %v1752_v58  ;;  %v1754_v63 = vmul.f32 1.442695, %v1751_v59  ;;  %v1822_v2 = vsel %vm270_vm3, %v1817_v62, 0 }
0x1310   :  { %2540 = vmatpush3.bf16.msra.mxu0 %v1822_v2  ;;  %v1769_v3 = vpop.permute.xlu0 %1768 }
0x1311   :  { %2687 = vpow2.f32 %v1754_v63  ;;  %v1774_v9 = vsel %vm270_vm3, %v1769_v3, 0  ;;  %2551 = vmatprep.subr.bf16.mxu0 %v2800_v0 }
0x1312   :  { %2534 = vmatpush3.bf16.msra.mxu1 %v1774_v9 }
0x1313   :  { %2545 = vmatprep.subr.bf16.mxu1 %v2800_v0 }
0x1319   :  { %v2686_v4 = vpop.eup %2685 }
0x131a   :  { %v1756_v44 = vsel %vm143_vm2, %v2686_v4, 0.0 }
0x131b   :  { %v2688_v48 = vpop.eup %2687  ;;  %1757 = vadd.xlane.f32.xlu0 %v1756_v44  ;;  %v2636_v44 = vld [vmem:[#allocation7 + $0x18] sm:$0xff]  }
0x131c   :  { %v1759_v49 = vsel %vm143_vm2, %v2688_v48, 0.0 }
0x131d   :  { %1760 = vadd.xlane.f32.xlu1 %v1759_v49 }
0x132e   :  { %1866 = vrot.lane.b32.xlu1 %v3098_v60, %s2809_s13 }
0x1331   :  { %1916 = vrot.lane.b32.xlu0 %v3100_v1, %s2809_s13 }
0x1332   :  { %1864 = vrot.lane.b32.xlu1 %v3098_v60, %s2810_s14 }
0x1335   :  { %1914 = vrot.lane.b32.xlu0 %v3100_v1, %s2810_s14 }
0x13a8   :  { %v1758_v5 = vpop.xlane.xlu0 %1757 }
0x13a9   :  { %2689 = vrcp.f32 %v1758_v5 }
0x13aa   :  { %v1761_v6 = vpop.xlane.xlu1 %1760 }
0x13ab   :  { %2691 = vrcp.f32 %v1761_v6 }
0x13ac   :  { %v1917_v15 = vpop.permute.xlu0 %1916 }
0x13ad   :  { %v1922_v17 = vsel %vm143_vm2, %v1917_v15, 0 }
0x13ae   :  { %v1867_v11 = vpop.permute.xlu1 %1866 }
0x13af   :  { %v1872_v12 = vsel %vm143_vm2, %v1867_v11, 0 }
0x13b0   :  { %v1915_v19 = vpop.permute.xlu0 %1914 }
0x13b2   :  { %v1865_v18 = vpop.permute.xlu1 %1864 }
0x13b3   :  { %v2690_v7 = vpop.eup %2689 }
0x13b4   :  { %v1764_v8 = vmul.f32 %v2690_v7, %v2686_v4  ;;  %v2635_v4 = vld [vmem:[#allocation7 + $0x10] sm:$0xff]  }
0x13b5   :  { %v2692_v10 = vpop.eup %2691 }
0x13b6   :  { %v1765_v13 = vmul.f32 %v2692_v10, %v2688_v48  ;;  %v1766_v14 = vpack.c.bf16 %v1764_v8, %v1764_v8 }
0x13b8   :  { %2536 = vmatmul.mubr.msk.bf16.vlgmr.msra.gmra.mrb[56].mxu1 %vm143_vm2, %v1766_v14  ;;  %v1767_v16 = vpack.c.bf16 %v1765_v13, %v1765_v13 }
0x13b9   :  { %2546 = vmatpush3.bf16.xpose.msra.mxu1 %v1872_v12  ;;  %2547 = vmatprep.mubr.msk.bf16.mxu1 %vm2801_vm0, %v2800_v0 }
0x13ba   :  { %2542 = vmatmul.mubr.msk.bf16.vlgmr.msra.gmra.mrb[60].mxu0 %vm143_vm2, %v1767_v16  ;;  %2557 = vmatprep.subr.bf16.mxu1 %v2800_v0 }
0x13bb   :  { %2552 = vmatpush3.bf16.xpose.msra.mxu0 %v1922_v17  ;;  %2553 = vmatprep.mubr.msk.bf16.mxu0 %vm2801_vm0, %v2800_v0 }
0x13bc   :  { %2563 = vmatprep.subr.bf16.mxu0 %v2800_v0 }
0x13c0   :  { %2548 = vmatmul.mubr.msk.bf16.vlgmr.msra.gmra.mrb[60].mxu1 %vm143_vm2, %v1865_v18 }
0x13c1   :  { %2559 = vmatprep.mubr.msk.bf16.mxu1 %vm2801_vm0, %v2800_v0 }
0x13c2   :  { %2554 = vmatmul.mubr.msk.bf16.vlgmr.msra.gmra.mrb[64].mxu0 %vm143_vm2, %v1915_v19 }
0x13c3   :  { %2565 = vmatprep.mubr.msk.bf16.mxu0 %vm2801_vm0, %v2800_v0 }
0x148b   :  { %v1810_v20 = vpop.f32.mrb[56].mxu1 }
0x148c   :  { %v2537_v21 = vpop.f32.mrb[57].mxu1 }
0x148d   :  { %v1813_v22 = vpop.f32.mrb[58].mxu1  ;;  %v1858_v23 = vpop.f32.mrb[60].mxu0 }
0x148e   :  { %v2618_v24 = vpack.i.bf16 %v1858_v23, %v1810_v20  ;;  %v2538_v25 = vpop.f32.mrb[59].mxu1  ;;  %v2543_v26 = vpop.f32.mrb[61].mxu0 }
0x148f   :  { %v1861_v27 = vpop.f32.mrb[62].mxu0 }
0x1490   :  { %v2544_v28 = vpop.f32.mrb[63].mxu0 }
0x1493   :  { %v1908_v29 = vpop.f32.mrb[60].mxu1 }
0x1494   :  { %v1964_v31 = vmul.f32 0.35355338, %v1908_v29  ;;  %v2549_v32 = vpop.f32.mrb[61].mxu1 }
0x1495   :  { %v1911_v35 = vpop.f32.mrb[62].mxu1  ;;  %v1958_v36 = vpop.f32.mrb[64].mxu0 }
0x1496   :  { %v1965_v37 = vmul.f32 0.35355338, %v1958_v36  ;;  %v2550_v38 = vpop.f32.mrb[63].mxu1  ;;  %v2555_v39 = vpop.f32.mrb[65].mxu0  ;;  %v1966_v40 = vsel %vm143_vm2, %v1964_v31, -inf }
0x1497   :  { %1967 = vmax.xlane.f32.xlu1 %v1966_v40  ;;  %v1961_v41 = vpop.f32.mrb[66].mxu0 }
0x1498   :  { %v2556_v42 = vpop.f32.mrb[67].mxu0  ;;  %v1969_v57 = vsel %vm143_vm2, %v1965_v37, -inf }
0x1499   :  { %1970 = vmax.xlane.f32.xlu0 %v1969_v57 }
0x1524   :  { %v1968_v43 = vpop.xlane.xlu1 %1967 }
0x1525   :  { %v1972_v46 = vsub.f32 %v1964_v31, %v1968_v43 }
0x1526   :  { %v1971_v47 = vpop.xlane.xlu0 %1970 }
0x1527   :  { %v1974_v50 = vmul.f32 1.442695, %v1972_v46  ;;  %v1973_v51 = vsub.f32 %v1965_v37, %v1971_v47 }
0x1529   :  { %2693 = vpow2.f32 %v1974_v50  ;;  %v1976_v52 = vmul.f32 1.442695, %v1973_v51 }
0x152b   :  { %2695 = vpow2.f32 %v1976_v52 }
0x1533   :  { %v2694_v53 = vpop.eup %2693 }
0x1534   :  { %v1978_v54 = vsel %vm143_vm2, %v2694_v53, 0.0 }
0x1535   :  { %v2696_v55 = vpop.eup %2695  ;;  %1979 = vadd.xlane.f32.xlu0 %v1978_v54 }
0x1536   :  { %v1981_v56 = vsel %vm143_vm2, %v2696_v55, 0.0 }
0x1537   :  { %1982 = vadd.xlane.f32.xlu1 %v1981_v56 }
0x1548   :  { %2038 = vrot.lane.b32.xlu1 %v3100_v1, %s2811_s15 }
0x154b   :  { %1990 = vrot.lane.b32.xlu0 %v3098_v60, %s2811_s15 }
0x154c   :  { %2614 = vrot.lane.b32.xlu1 %v2613_v34, %s2812_s16 }
0x154f   :  { %2619 = vrot.lane.b32.xlu0 %v2618_v24, %s2813_s1 }
0x15c2   :  { %v1980_v58 = vpop.xlane.xlu0 %1979 }
0x15c3   :  { %2697 = vrcp.f32 %v1980_v58 }
0x15c4   :  { %v1983_v59 = vpop.xlane.xlu1 %1982 }
0x15c5   :  { %2699 = vrcp.f32 %v1983_v59 }
0x15c6   :  { %v1991_v62 = vpop.permute.xlu0 %1990 }
0x15c7   :  { %v1996_v63 = vsel %vm270_vm3, %v1991_v62, 0 }
0x15c8   :  { %v2039_v2 = vpop.permute.xlu1 %2038  ;;  %2558 = vmatpush3.bf16.msra.mxu1 %v1996_v63 }
0x15c9   :  { %v2044_v1 = vsel %vm270_vm3, %v2039_v2, 0  ;;  %2569 = vmatprep.subr.bf16.mxu1 %v2800_v0 }
0x15ca   :  { %2564 = vmatpush3.bf16.msra.mxu0 %v2044_v1  ;;  %v2620_v16 = vpop.permute.xlu0 %2619 }
0x15cb   :  { %v2622_v18 = vunpack.i.h.bf16 %v2620_v16  ;;  %v2621_v19 = vunpack.i.l.bf16 %v2620_v16 }
0x15cc   :  { %v2615_v14 = vpop.permute.xlu1 %2614 }
0x15cd   :  { %v2698_v60 = vpop.eup %2697  ;;  %v2617_v15 = vunpack.i.h.bf16 %v2615_v14  ;;  %v2616_v12 = vunpack.i.l.bf16 %v2615_v14 }
0x15ce   :  { %v1986_v3 = vmul.f32 %v2698_v60, %v2694_v53 }
0x15cf   :  { %v2700_v30 = vpop.eup %2699  ;;  %v2110_v17 = vsel %vm143_vm2, %v3154_v61, %v2616_v12  ;;  %v2273_v61 = vld [vmem:[%s3288_s4 + $0x1] ss:$0 sm:$0xff]  ;;  %s2815_s4 = smov [#allocation8]  }
0x15d0   :  { %v1987_v33 = vmul.f32 %v2700_v30, %v2696_v55  ;;  %v1988_v34 = vpack.c.bf16 %v1986_v3, %v1986_v3  ;;  %v2112_v23 = vsel %vm1054_vm4, %v2110_v17, %v2621_v19  ;;  %s2216_s23 = sshll.u32 %s2815_s4, 4  ;;  %s2217_s23 = int_to_ptr.vmem [resolvable:$true] %s2216_s23 }
0x15d1   :  { %s2767_s24 = scalar_lea.vmem %s2217_s23, 32  ;;  %p2772_p11 = scmp.lt.s32.totalorder %s2217_s23, %s2217_s23 }
0x15d2   :  { %2560 = vmatmul.mubr.msk.bf16.vlgmr.msra.gmra.mrb[64].mxu1 %vm143_vm2, %v1988_v34  ;;  %v1989_v9 = vpack.c.bf16 %v1987_v33, %v1987_v33  ;;  %p2768_p10 = scmp.ne.s32.totalorder %s2217_s23, %s2767_s24  ;;  %p2773_p12 = scmp.lt.s32.totalorder %s2767_s24, %s2767_s24 }
0x15d3   :  { %2573 = vmatprep.mubr.msk.bf16.mxu1 %vm2801_vm0, %v2800_v0  ;;  %2570 = vmatpush3.bf16.msra.mxu1 %v2635_v4 }
0x15d4   :  { %2566 = vmatmul.mubr.msk.bf16.vlgmr.msra.gmra.mrb[68].mxu0 %vm143_vm2, %v1989_v9  ;;  %2571 = vmatprep.subr.bf16.mxu1 %v2800_v0  ;;  %v2111_v0 = vsel %vm143_vm2, %v3156_v45, %v2617_v15  ;;  %p2774_p13 = por %p2773_p12, %p2772_p11 }
0x15d5   :  { %v2113_v24 = vsel %vm1054_vm4, %v2111_v0, %v2622_v18 }
0x15d6   :  { %p2775_p0 = pnand %p2774_p13, %p2768_p10 }
0x15d7   :  { %2572 = vmatpush3.bf16.msra.mxu1 %v2636_v44 }
0x16a5   :  { %v2032_v48 = vpop.f32.mrb[64].mxu1 }
0x16a6   :  { %v2561_v49 = vpop.f32.mrb[65].mxu1 }
0x16a7   :  { %v2035_v5 = vpop.f32.mrb[66].mxu1  ;;  %v2080_v6 = vpop.f32.mrb[68].mxu0 }
0x16a8   :  { %v2623_v7 = vpack.i.bf16 %v2080_v6, %v2032_v48  ;;  %v2562_v8 = vpop.f32.mrb[67].mxu1  ;;  %v2567_v10 = vpop.f32.mrb[69].mxu0 }
0x16a9   :  { %v2083_v11 = vpop.f32.mrb[70].mxu0 }
0x16aa   :  { %2624 = vrot.lane.b32.xlu1 %v2623_v7, %s2814_s17  ;;  %v2568_v13 = vpop.f32.mrb[71].mxu0 }
0x171c   :  { %v2625_v20 = vpop.permute.xlu1 %2624 }
0x171d   :  { %v2627_v21 = vunpack.i.h.bf16 %v2625_v20  ;;  %v2626_v22 = vunpack.i.l.bf16 %v2625_v20 }
0x171f   :  { %v2115_v25 = vsel %vm1057_vm5, %v2113_v24, %v2627_v21  ;;  %v2114_v26 = vsel %vm1057_vm5, %v2112_v23, %v2626_v22 }
0x1720   :  { %v2116_v27 = vpack.c.bf16 %v2115_v25, %v2114_v26 }
0x1722   :  { %2574 = vmatmul.mubr.msk.bf16.vlgmr.msra.gmra.mrb[68].mxu1 %vm93_vm1, %v2116_v27 }
0x17f5   :  { %v2179_v45 = vpop.f32.mrb[68].mxu1 }
0x17f6   :  { %v2180_v28 = vadd.f32 %v2273_v61, %v2179_v45  ;;  %v2575_v29 = vpop.f32.mrb[69].mxu1 }
0x17f7   :  { %v2182_v31 = vpop.f32.mrb[70].mxu1 }
0x17f8   :  { %v2186_v32 = vsel %vm93_vm1, %v2180_v28, 0.0  ;;  %v2183_v35 = vadd.f32 %v2273_v61, %v2182_v31  ;;  %v2576_v36 = vpop.f32.mrb[71].mxu1 }
0x17f9   :  { %v2187_v37 = vrot.slane %v2186_v32, 4 }
0x17fa   :  { %v2193_v38 = vsel %vm93_vm1, %v2183_v35, 0.0 }
0x17fb   :  { %v2188_v39 = vadd.f32 %v2187_v37, %v2186_v32  ;;  %v2194_v40 = vrot.slane %v2193_v38, 4 }
0x17fd   :  { %v2189_v41 = vrot.slane %v2188_v39, 2  ;;  %v2195_v42 = vadd.f32 %v2194_v40, %v2193_v38 }
0x17ff   :  { %v2190_v57 = vadd.f32 %v2189_v41, %v2188_v39  ;;  %v2196_v43 = vrot.slane %v2195_v42, 2 }
0x1801   :  { %v2191_v46 = vrot.slane %v2190_v57, 1  ;;  %v2197_v47 = vadd.f32 %v2196_v43, %v2195_v42 }
0x1803   :  { %v2192_v50 = vadd.f32 %v2191_v46, %v2190_v57  ;;  %v2198_v51 = vrot.slane %v2197_v47, 1 }
0x1805   :  { %v2199_v52 = vadd.f32 %v2198_v51, %v2197_v47  ;;  %v2201_v53 = vmul.f32 0.125, %v2192_v50 }
0x1807   :  { %v2202_v54 = vmul.f32 0.125, %v2199_v52 }
0x1809   :  { %v2206_v55 = vsel %vm2205_vm6, %v2202_v54, %v2201_v53 }
0x180a   :  { %2209 = vst.msk [vmem:[#allocation8] sm:$0x3] %vm2208_vm7, %v2206_v55 }
0x180b   :  { %2778 = shalt.err (!%p2775_p0)
}
0x180c   :  { %s2779_s27 = scalar_lea.hbm %s3289_s5, 32 }
0x180d   :  { %p2780_p1 = scmp.ne.s32.totalorder %s3289_s5, %s2779_s27  ;;  %p2783_p2 = scmp.lt.u32.totalorder %s2779_s27, %s3289_s5 }
0x180f   :  { %p2785_p3 = pnand %p2783_p2, %p2780_p1 }
0x1811   :  { %2788 = shalt.err (!%p2785_p3)
}
0x1812   :  { %2219 = dma.vmem_to_hbm [thread:$0]  %s2217_s23, 32, %s3289_s5, [#allocation4]  }
0x1813   :  { %2793 = dma.done.wait [#allocation4], 32  }
0x1814   :  { %2794 = vsyncadd [#allocation4], 4294967264 }
0x1815   :  { %2223 = vsyncpa [#allocation3], 1 }
0x1816   :  { %2224 = vsyncpa [#allocation6], 1 }
0x1817   :  { %2225 = vsyncpa [#allocation4], 1 }

</bundles_post_ra>
